<compile_context>
chip_gen: v7x
topology: tpu7x:2x2x1
jax: 0.10.0
libtpu: 0.0.40
codegen_flags: <defaults>
</compile_context>

<pallas_src>
import numpy as np
import jax
import jax.numpy as jnp
from jax import lax
from jax.experimental import pallas as pl
from jax.experimental.pallas import tpu as pltpu


# Scale-2 half-pixel bilinear blend matrices, written as
#   u[2*i + phase + k - 1] = sum_d A[phase][d, k] * x_ext[i + d - 1]
# (k = conv tap 0..2, d = low-res offset index 0..2 for offsets -1..+1,
#  x_ext = x extended by edge replication).
_A_PHASE = np.array(
    [[[0.75, 0.25, 0.00],
      [0.25, 0.75, 0.75],
      [0.00, 0.00, 0.25]],
     [[0.25, 0.00, 0.00],
      [0.75, 0.75, 0.25],
      [0.00, 0.25, 0.75]]], dtype=np.float32)


def _vmem_capacity_bytes(default=64 * 1024 * 1024):
    try:
        info = pltpu.get_tpu_info()
        cap = int(getattr(info, "vmem_capacity_bytes", 0))
        return cap if cap > 0 else default
    except Exception:
        return default


def _pick_row_tile(N, H, W, Cin, Cout, itemsize, vmem_budget, row_cap=None):
    """Largest divisor of H whose per-step working set fits the VMEM budget,
    preferring >= 4 grid steps so both v7x TensorCores and the double-buffered
    pipeline have work."""
    def est_bytes(tir):
        in_tile = (tir + 2) * W * Cin * itemsize
        acc = tir * W * 4 * Cout * 4                      # f32 accumulator
        out_blk = tir * W * 4 * Cout * itemsize
        wts = (9 * Cin * 4 * Cout + 2 * 2 * 3 * Cin * 2 * Cout) * itemsize
        return (12 * in_tile          # xe/xl/xr + 3 K-concatenated tap planes
                + 2 * acc             # acc + biased/reshaped copy
                + 2 * 2 * out_blk     # double-buffered output block
                + 2 * 3 * in_tile     # double-buffered input blocks
                + 2 * wts)            # double-buffered constant weights

    divs = [d for d in range(H, 0, -1) if H % d == 0]
    if row_cap is not None:
        capped = [d for d in divs if d <= row_cap]
        divs = capped if capped else [1]
    fitting = [d for d in divs if est_bytes(d) <= vmem_budget] or [divs[-1]]
    min_steps = min(4, N * H)
    for d in fitting:
        if N * (H // d) >= min_steps:
            return d
    return fitting[-1]


def _make_kernel(TIR, W, Cin, Cout):
    """Folded (2x bilinear upsample + 3x3 conv) kernel for one (batch, row-tile)."""
    K3 = 3 * Cin
    C2 = 2 * Cout
    C4 = 4 * Cout

    def kernel(xm_ref, xt_ref, xb_ref, wk_ref, wlr_ref, wtb_ref, wc_ref, b_ref,
               o_ref):
        j = pl.program_id(1)
        last = pl.num_programs(1) - 1
        f32 = jnp.float32

        # Low-res tile + 1-row halos (clamped at the image edges by the
        # BlockSpec index maps = bilinear edge replication).
        xe = jnp.concatenate([xt_ref[0], xm_ref[0], xb_ref[0]], axis=0)  # (TIR+2, W, Cin)
        # Column-replicated shifts = the dw = -1 / +1 taps of the folded conv.
        xl = jnp.concatenate([xe[:, :1], xe[:, :-1]], axis=1)
        xr = jnp.concatenate([xe[:, 1:], xe[:, -1:]], axis=1)

        def row_taps(xs):  # K-concat of the 3 row taps -> (TIR*W, 3*Cin)
            return jnp.concatenate(
                [xs[0:TIR], xs[1:TIR + 1], xs[2:TIR + 2]], axis=-1
            ).reshape(TIR * W, K3)

        # Folded upsample+conv: 3 dots, K = 3*Cin, N = 4*Cout (all phases).
        acc = jnp.dot(row_taps(xl), wk_ref[0], preferred_element_type=f32)
        acc = acc + jnp.dot(row_taps(xe), wk_ref[1], preferred_element_type=f32)
        acc = acc + jnp.dot(row_taps(xr), wk_ref[2], preferred_element_type=f32)
        y = (acc + b_ref[...]).reshape(TIR, W, C4)   # lanes = (ph, pw, co)

        o_ref[0, :, 0, :, :] = y[:, :, :C2].astype(o_ref.dtype)   # row phase 0
        o_ref[0, :, 1, :, :] = y[:, :, C2:].astype(o_ref.dtype)   # row phase 1

        # ---- conv zero-padding fix-ups (1-pixel output frame only) --------
        # The folded weights assume bilinear edge replication everywhere; the
        # conv instead zero-pads the UPSAMPLED image, which differs only on
        # the outermost output ring.
        def col_taps(c):  # (TIR+2, Cin) -> (TIR, 3*Cin)
            return jnp.concatenate([c[0:TIR], c[1:TIR + 1], c[2:TIR + 2]],
                                   axis=-1)

        col_l = xe[:, 0, :]
        col_r = xe[:, W - 1, :]
        Lc = jnp.dot(col_taps(col_l), wlr_ref[0], preferred_element_type=f32)
        Rc = jnp.dot(col_taps(col_r), wlr_ref[1], preferred_element_type=f32)
        # left output column (q = 0): col-phase-0 lanes of both row phases
        o_ref[0, :, 0, 0, 0:Cout] = (
            o_ref[0, :, 0, 0, 0:Cout].astype(f32) - Lc[:, 0:Cout]
        ).astype(o_ref.dtype)
        o_ref[0, :, 1, 0, 0:Cout] = (
            o_ref[0, :, 1, 0, 0:Cout].astype(f32) - Lc[:, Cout:]
        ).astype(o_ref.dtype)
        # right output column (q = 2W-1): col-phase-1 lanes
        o_ref[0, :, 0, W - 1, Cout:C2] = (
            o_ref[0, :, 0, W - 1, Cout:C2].astype(f32) - Rc[:, 0:Cout]
        ).astype(o_ref.dtype)
        o_ref[0, :, 1, W - 1, Cout:C2] = (
            o_ref[0, :, 1, W - 1, Cout:C2].astype(f32) - Rc[:, Cout:]
        ).astype(o_ref.dtype)

        @pl.when(j == 0)
        def _top():
            row0 = xe[1]                                            # = x[0]
            rl = jnp.concatenate([row0[0:1], row0[:-1]], axis=0)
            rr = jnp.concatenate([row0[1:], row0[W - 1:W]], axis=0)
            t3 = jnp.concatenate([rl, row0, rr], axis=-1)           # (W, 3*Cin)
            Tc = jnp.dot(t3, wtb_ref[0], preferred_element_type=f32)  # (W, 2*Cout)
            o_ref[0, 0, 0, :, :] = (
                o_ref[0, 0, 0, :, :].astype(f32) - Tc).astype(o_ref.dtype)
            # corner add-backs (row and column fix-ups both removed them)
            ctl = jnp.dot(row0[0:1], wc_ref[0, 0], preferred_element_type=f32)
            ctr = jnp.dot(row0[W - 1:W], wc_ref[0, 1], preferred_element_type=f32)
            o_ref[0, 0:1, 0, 0, 0:Cout] = (
                o_ref[0, 0:1, 0, 0, 0:Cout].astype(f32) + ctl).astype(o_ref.dtype)
            o_ref[0, 0:1, 0, W - 1, Cout:C2] = (
                o_ref[0, 0:1, 0, W - 1, Cout:C2].astype(f32) + ctr
            ).astype(o_ref.dtype)

        @pl.when(j == last)
        def _bottom():
            rowH = xe[TIR]                                          # = x[H-1]
            rl = jnp.concatenate([rowH[0:1], rowH[:-1]], axis=0)
            rr = jnp.concatenate([rowH[1:], rowH[W - 1:W]], axis=0)
            b3 = jnp.concatenate([rl, rowH, rr], axis=-1)
            Bc = jnp.dot(b3, wtb_ref[1], preferred_element_type=f32)
            o_ref[0, TIR - 1, 1, :, :] = (
                o_ref[0, TIR - 1, 1, :, :].astype(f32) - Bc).astype(o_ref.dtype)
            cbl = jnp.dot(rowH[0:1], wc_ref[1, 0], preferred_element_type=f32)
            cbr = jnp.dot(rowH[W - 1:W], wc_ref[1, 1], preferred_element_type=f32)
            o_ref[0, TIR - 1:TIR, 1, 0, 0:Cout] = (
                o_ref[0, TIR - 1:TIR, 1, 0, 0:Cout].astype(f32) + cbl
            ).astype(o_ref.dtype)
            o_ref[0, TIR - 1:TIR, 1, W - 1, Cout:C2] = (
                o_ref[0, TIR - 1:TIR, 1, W - 1, Cout:C2].astype(f32) + cbr
            ).astype(o_ref.dtype)

    return kernel


def upsample_conv_fused(x_nhwc, w_hwio, b, *, row_cap=None):
    """Fused 2x bilinear upsample + 3x3 same conv (folded weights).

    x_nhwc: (N, H, W, Cin), w_hwio: (3, 3, Cin, Cout), b: (Cout,)
    Returns (N, H, 2, W, 2*Cout) where out[n, i, ph, t, pw*Cout+co]
    == y[n, 2i+ph, 2t+pw, co]; reshape to (N, 2H, 2W, Cout) is free.
    """
    N, H, W, Cin = x_nhwc.shape
    Cout = w_hwio.shape[-1]
    dt = x_nhwc.dtype

    # ---- trace-time weight folding (sub-pixel / deconv-as-conv trick) -----
    w32 = w_hwio.astype(jnp.float32)
    A = _A_PHASE
    wf = jnp.einsum('phk,qwl,klio->pqhwio', A, A, w32)   # (ph, pw, dh, dw, ci, co)
    wk = jnp.transpose(wf, (3, 2, 4, 0, 1, 5)).reshape(3, 3 * Cin, 4 * Cout)
    # half-folded weights for the zero-padding fix-ups on the output frame
    wl = jnp.einsum('phk,kio->phio', A, w32[:, 0])
    wr = jnp.einsum('phk,kio->phio', A, w32[:, 2])
    wt = jnp.einsum('qwl,lio->qwio', A, w32[0, :])
    wb_ = jnp.einsum('qwl,lio->qwio', A, w32[2, :])

    def _flat(m):  # (phase, d, ci, co) -> (3*Cin, 2*Cout), K=(d,ci), N=(phase,co)
        return jnp.transpose(m, (1, 2, 0, 3)).reshape(3 * Cin, 2 * Cout)

    wlr = jnp.stack([_flat(wl), _flat(wr)])               # (2, 3*Cin, 2*Cout)
    wtb = jnp.stack([_flat(wt), _flat(wb_)])
    wc = w32[::2, ::2]                                    # (2, 2, Cin, Cout) corners
    b4 = jnp.tile(b.astype(jnp.float32), 4).reshape(1, 4 * Cout)

    # bf16 (= input dtype) MXU operands; accumulation stays f32 in-kernel.
    wk = wk.astype(dt)
    wlr = wlr.astype(dt)
    wtb = wtb.astype(dt)
    wc = wc.astype(dt)

    # ---- generation-aware tiling / VMEM sizing -----------------------------
    vmem_cap = _vmem_capacity_bytes()
    itemsize = x_nhwc.dtype.itemsize
    TIR = _pick_row_tile(N, H, W, Cin, Cout, itemsize,
                         vmem_budget=max(int(0.4 * vmem_cap), 8 * 1024 * 1024),
                         row_cap=row_cap)
    n_row = H // TIR
    vmem_limit = max(32 * 1024 * 1024,
                     int(min(0.75 * vmem_cap, 112 * 1024 * 1024)))

    kernel = _make_kernel(TIR, W, Cin, Cout)

    return pl.pallas_call(
        kernel,
        out_shape=jax.ShapeDtypeStruct((N, H, 2, W, 2 * Cout), dt),
        grid=(N, n_row),
        in_specs=[
            # main row tile
            pl.BlockSpec((1, TIR, W, Cin), lambda n, j: (n, j, 0, 0)),
            # 1-row halo above / below, clamped at the image edges
            # (= bilinear edge replication).  Folding these into the main
            # block would save 2 DMA issues/step but needs element-indexed
            # overlapping blocks; kept separate for portability.
            pl.BlockSpec((1, 1, W, Cin),
                         lambda n, j: (n, jnp.maximum(j * TIR - 1, 0), 0, 0)),
            pl.BlockSpec((1, 1, W, Cin),
                         lambda n, j: (n, jnp.minimum((j + 1) * TIR, H - 1), 0, 0)),
            # constant folded weights / fix-up weights / bias (index-invariant
            # blocks stay VMEM-resident; pl.Buffered(1) would drop the second
            # buffer on v7x but is left off for portability).
            pl.BlockSpec((3, 3 * Cin, 4 * Cout), lambda n, j: (0, 0, 0)),
            pl.BlockSpec((2, 3 * Cin, 2 * Cout), lambda n, j: (0, 0, 0)),
            pl.BlockSpec((2, 3 * Cin, 2 * Cout), lambda n, j: (0, 0, 0)),
            pl.BlockSpec((2, 2, Cin, Cout), lambda n, j: (0, 0, 0, 0)),
            pl.BlockSpec((1, 4 * Cout), lambda n, j: (0, 0)),
        ],
        out_specs=pl.BlockSpec((1, TIR, 2, W, 2 * Cout),
                               lambda n, j: (n, j, 0, 0, 0)),
        compiler_params=pltpu.CompilerParams(
            dimension_semantics=("parallel", "parallel"),
            vmem_limit_bytes=vmem_limit),
    )(x_nhwc, x_nhwc, x_nhwc, wk, wlr, wtb, wc, b4)


def upsample_forward(x_nchw, w_oihw, b, *, row_cap=None):
    """Pallas equivalent of Upsample.forward. NCHW in -> NCHW out."""
    N, Cin, H, W = x_nchw.shape
    Cout = w_oihw.shape[0]
    x = jnp.transpose(x_nchw, (0, 2, 3, 1))        # NCHW -> NHWC (1x-sized input)
    w = jnp.transpose(w_oihw, (2, 3, 1, 0))        # OIHW -> HWIO
    y = upsample_conv_fused(x, w, b, row_cap=row_cap)   # (N, H, 2, W, 2*Cout)
    # (H,2)->2H and (W,2*Cout)->(2W,Cout) are adjacent-dim regroupings: the
    # reshape is free.  The only real data movement outside the kernel is the
    # standard NHWC->NCHW transpose the PyTorch layout requires.
    y = y.reshape(N, 2 * H, 2 * W, Cout)
    return jnp.transpose(y, (0, 3, 1, 2))


def reference_forward(x_nchw, w_oihw, b):
    """Pure-JAX reference (same math; conv via lax.conv_general_dilated)."""
    x = jnp.transpose(x_nchw, (0, 2, 3, 1)).astype(jnp.float32)
    N, H, W, C = x.shape
    xp = jnp.concatenate([x[:, :1], x[:, :-1]], axis=1)
    xn = jnp.concatenate([x[:, 1:], x[:, -1:]], axis=1)
    x = jnp.stack([0.25 * xp + 0.75 * x, 0.75 * x + 0.25 * xn], axis=2)
    x = x.reshape(N, 2 * H, W, C)
    yp = jnp.concatenate([x[:, :, :1], x[:, :, :-1]], axis=2)
    yn = jnp.concatenate([x[:, :, 1:], x[:, :, -1:]], axis=2)
    x = jnp.stack([0.25 * yp + 0.75 * x, 0.75 * x + 0.25 * yn], axis=3)
    x = x.reshape(N, 2 * H, 2 * W, C)
    w = jnp.transpose(w_oihw, (2, 3, 1, 0)).astype(jnp.float32)
    y = lax.conv_general_dilated(x, w, (1, 1), ((1, 1), (1, 1)),
                                 dimension_numbers=('NHWC', 'HWIO', 'NHWC'))
    y = y + b.astype(jnp.float32).reshape(1, 1, 1, -1)
    return jnp.transpose(y, (0, 3, 1, 2))


if __name__ == "__main__":
    key = jax.random.PRNGKey(0)
    k1, k2, k3, k4 = jax.random.split(key, 4)

    # --- shapes implied by the module: batch=2, channels=4, spatial=16 ------
    N, Cin, H, W = 2, 4, 16, 16
    Cout = Cin  # out_ch defaults to in_ch
    fan_in = Cin * 3 * 3
    bound = 1.0 / np.sqrt(fan_in)
    x = jax.random.normal(k1, (N, Cin, H, W), dtype=jnp.float32)
    w = jax.random.uniform(k2, (Cout, Cin, 3, 3), jnp.float32, -bound, bound)
    b = jax.random.uniform(k3, (Cout,), jnp.float32, -bound, bound)

    y = jax.block_until_ready(upsample_forward(x, w, b))
    assert y.shape == (N, Cout, 2 * H, 2 * W)
    y_ref = jax.block_until_ready(reference_forward(x, w, b))
    np.testing.assert_allclose(np.asarray(y), np.asarray(y_ref),
                               rtol=1e-4, atol=1e-4)

    # --- smaller row tile: forces pure-interior tiles through the fix-ups ---
    y2 = jax.block_until_ready(upsample_forward(x, w, b, row_cap=4))
    np.testing.assert_allclose(np.asarray(y2), np.asarray(y_ref),
                               rtol=1e-4, atol=1e-4)

    # --- rectangular image, Cin != Cout, non-power-of-two channels ----------
    N2, C2i, C2o, H2, W2 = 1, 3, 5, 12, 8
    x2 = jax.random.normal(k4, (N2, C2i, H2, W2), dtype=jnp.float32)
    w2 = jax.random.uniform(k2, (C2o, C2i, 3, 3), jnp.float32, -bound, bound)
    b2 = jax.random.uniform(k3, (C2o,), jnp.float32, -bound, bound)
    yo = jax.block_until_ready(upsample_forward(x2, w2, b2))
    yo_ref = jax.block_until_ready(reference_forward(x2, w2, b2))
    np.testing.assert_allclose(np.asarray(yo), np.asarray(yo_ref),
                               rtol=1e-4, atol=1e-4)

    # --- bf16 path: bf16 MXU operands with f32 accumulation -----------------
    yb = jax.block_until_ready(upsample_forward(x.astype(jnp.bfloat16), w, b))
    np.testing.assert_allclose(np.asarray(yb, dtype=np.float32),
                               np.asarray(y_ref), rtol=1e-1, atol=1e-1)

    print("KERNEL_OK")
</pallas_src>

<mosaic_0001>
module attributes {stable_mosaic.version = 11 : i64} {
  func.func @kernel(%arg0: i32, %arg1: i32, %arg2: memref<1x8x16x4xf32, #tpu.memory_space<vmem>>, %arg3: memref<1x1x16x4xf32, #tpu.memory_space<vmem>>, %arg4: memref<1x1x16x4xf32, #tpu.memory_space<vmem>>, %arg5: memref<3x12x16xf32, #tpu.memory_space<vmem>>, %arg6: memref<2x12x8xf32, #tpu.memory_space<vmem>>, %arg7: memref<2x12x8xf32, #tpu.memory_space<vmem>>, %arg8: memref<2x2x4x4xf32, #tpu.memory_space<vmem>>, %arg9: memref<1x16xf32, #tpu.memory_space<vmem>>, %arg10: memref<1x8x2x16x8xf32, #tpu.memory_space<vmem>>) attributes {dimension_semantics = [#tpu.dimension_semantics<parallel>, #tpu.dimension_semantics<parallel>], iteration_bounds = array<i64: 2, 2>, scalar_prefetch = 0 : i64, scratch_operands = 0 : i64, tpu.core_type = #tpu.core_type<tc>, window_params = [{transform_indices = @transform_0, window_bounds = array<i64: 1, 8, 16, 4>}, {transform_indices = @transform_1, window_bounds = array<i64: 1, 1, 16, 4>}, {transform_indices = @transform_2, window_bounds = array<i64: 1, 1, 16, 4>}, {pipeline_mode = #tpu.pipeline_mode<synchronous>, transform_indices = @transform_3, window_bounds = array<i64: 3, 12, 16>}, {pipeline_mode = #tpu.pipeline_mode<synchronous>, transform_indices = @transform_4, window_bounds = array<i64: 2, 12, 8>}, {pipeline_mode = #tpu.pipeline_mode<synchronous>, transform_indices = @transform_5, window_bounds = array<i64: 2, 12, 8>}, {pipeline_mode = #tpu.pipeline_mode<synchronous>, transform_indices = @transform_6, window_bounds = array<i64: 2, 2, 4, 4>}, {pipeline_mode = #tpu.pipeline_mode<synchronous>, transform_indices = @transform_7, window_bounds = array<i64: 1, 16>}, {transform_indices = @transform_8, window_bounds = array<i64: 1, 8, 2, 16, 8>}]} {
    %c0 = arith.constant 0 : index
    %c0_0 = arith.constant 0 : index
    %c0_1 = arith.constant 0 : index
    %c0_2 = arith.constant 0 : index
    %0 = vector.load %arg3[%c0, %c0_0, %c0_1, %c0_2] : memref<1x1x16x4xf32, #tpu.memory_space<vmem>>, vector<1x1x16x4xf32>
    %1 = vector.shape_cast %0 : vector<1x1x16x4xf32> to vector<1x16x4xf32>
    %c0_3 = arith.constant 0 : index
    %c0_4 = arith.constant 0 : index
    %c0_5 = arith.constant 0 : index
    %c0_6 = arith.constant 0 : index
    %2 = vector.load %arg2[%c0_3, %c0_4, %c0_5, %c0_6] : memref<1x8x16x4xf32, #tpu.memory_space<vmem>>, vector<1x8x16x4xf32>
    %3 = vector.shape_cast %2 : vector<1x8x16x4xf32> to vector<8x16x4xf32>
    %c0_7 = arith.constant 0 : index
    %c0_8 = arith.constant 0 : index
    %c0_9 = arith.constant 0 : index
    %c0_10 = arith.constant 0 : index
    %4 = vector.load %arg4[%c0_7, %c0_8, %c0_9, %c0_10] : memref<1x1x16x4xf32, #tpu.memory_space<vmem>>, vector<1x1x16x4xf32>
    %5 = vector.shape_cast %4 : vector<1x1x16x4xf32> to vector<1x16x4xf32>
    %6 = tpu.concatenate %1, %3, %5 in 0 : vector<1x16x4xf32>, vector<8x16x4xf32>, vector<1x16x4xf32> -> vector<10x16x4xf32>
    %7 = vector.extract_strided_slice %6 {offsets = [0, 0, 0], sizes = [10, 1, 4], strides = [1, 1, 1]} : vector<10x16x4xf32> to vector<10x1x4xf32>
    %8 = vector.extract_strided_slice %6 {offsets = [0, 0, 0], sizes = [10, 15, 4], strides = [1, 1, 1]} : vector<10x16x4xf32> to vector<10x15x4xf32>
    %9 = tpu.concatenate %7, %8 in 1 : vector<10x1x4xf32>, vector<10x15x4xf32> -> vector<10x16x4xf32>
    %10 = vector.extract_strided_slice %6 {offsets = [0, 1, 0], sizes = [10, 15, 4], strides = [1, 1, 1]} : vector<10x16x4xf32> to vector<10x15x4xf32>
    %11 = vector.extract_strided_slice %6 {offsets = [0, 15, 0], sizes = [10, 1, 4], strides = [1, 1, 1]} : vector<10x16x4xf32> to vector<10x1x4xf32>
    %12 = tpu.concatenate %10, %11 in 1 : vector<10x15x4xf32>, vector<10x1x4xf32> -> vector<10x16x4xf32>
    %13 = vector.extract_strided_slice %9 {offsets = [0, 0, 0], sizes = [8, 16, 4], strides = [1, 1, 1]} : vector<10x16x4xf32> to vector<8x16x4xf32>
    %14 = vector.extract_strided_slice %9 {offsets = [1, 0, 0], sizes = [8, 16, 4], strides = [1, 1, 1]} : vector<10x16x4xf32> to vector<8x16x4xf32>
    %15 = vector.extract_strided_slice %9 {offsets = [2, 0, 0], sizes = [8, 16, 4], strides = [1, 1, 1]} : vector<10x16x4xf32> to vector<8x16x4xf32>
    %16 = tpu.concatenate %13, %14, %15 in 2 : vector<8x16x4xf32>, vector<8x16x4xf32>, vector<8x16x4xf32> -> vector<8x16x12xf32>
    %17 = vector.shape_cast %16 : vector<8x16x12xf32> to vector<128x12xf32>
    %c0_11 = arith.constant 0 : index
    %c0_12 = arith.constant 0 : index
    %c0_13 = arith.constant 0 : index
    %18 = vector.load %arg5[%c0_11, %c0_12, %c0_13] : memref<3x12x16xf32, #tpu.memory_space<vmem>>, vector<1x12x16xf32>
    %19 = vector.shape_cast %18 : vector<1x12x16xf32> to vector<12x16xf32>
    %cst = arith.constant dense<0.000000e+00> : vector<128x16xf32>
    %20 = tpu.matmul %17, %19, %cst {dimension_numbers = #tpu.dot_dimension_numbers<[1], [0], [0], [1], [0, 0, 1, 1], [], []>} : vector<128x12xf32>, vector<12x16xf32>, vector<128x16xf32> -> vector<128x16xf32>
    %21 = vector.extract_strided_slice %6 {offsets = [0, 0, 0], sizes = [8, 16, 4], strides = [1, 1, 1]} : vector<10x16x4xf32> to vector<8x16x4xf32>
    %22 = vector.extract_strided_slice %6 {offsets = [1, 0, 0], sizes = [8, 16, 4], strides = [1, 1, 1]} : vector<10x16x4xf32> to vector<8x16x4xf32>
    %23 = vector.extract_strided_slice %6 {offsets = [2, 0, 0], sizes = [8, 16, 4], strides = [1, 1, 1]} : vector<10x16x4xf32> to vector<8x16x4xf32>
    %24 = tpu.concatenate %21, %22, %23 in 2 : vector<8x16x4xf32>, vector<8x16x4xf32>, vector<8x16x4xf32> -> vector<8x16x12xf32>
    %25 = vector.shape_cast %24 : vector<8x16x12xf32> to vector<128x12xf32>
    %c1 = arith.constant 1 : index
    %c0_14 = arith.constant 0 : index
    %c0_15 = arith.constant 0 : index
    %26 = vector.load %arg5[%c1, %c0_14, %c0_15] : memref<3x12x16xf32, #tpu.memory_space<vmem>>, vector<1x12x16xf32>
    %27 = vector.shape_cast %26 : vector<1x12x16xf32> to vector<12x16xf32>
    %cst_16 = arith.constant dense<0.000000e+00> : vector<128x16xf32>
    %28 = tpu.matmul %25, %27, %cst_16 {dimension_numbers = #tpu.dot_dimension_numbers<[1], [0], [0], [1], [0, 0, 1, 1], [], []>} : vector<128x12xf32>, vector<12x16xf32>, vector<128x16xf32> -> vector<128x16xf32>
    %29 = arith.addf %20, %28 : vector<128x16xf32>
    %30 = vector.extract_strided_slice %12 {offsets = [0, 0, 0], sizes = [8, 16, 4], strides = [1, 1, 1]} : vector<10x16x4xf32> to vector<8x16x4xf32>
    %31 = vector.extract_strided_slice %12 {offsets = [1, 0, 0], sizes = [8, 16, 4], strides = [1, 1, 1]} : vector<10x16x4xf32> to vector<8x16x4xf32>
    %32 = vector.extract_strided_slice %12 {offsets = [2, 0, 0], sizes = [8, 16, 4], strides = [1, 1, 1]} : vector<10x16x4xf32> to vector<8x16x4xf32>
    %33 = tpu.concatenate %30, %31, %32 in 2 : vector<8x16x4xf32>, vector<8x16x4xf32>, vector<8x16x4xf32> -> vector<8x16x12xf32>
    %34 = vector.shape_cast %33 : vector<8x16x12xf32> to vector<128x12xf32>
    %c2 = arith.constant 2 : index
    %c0_17 = arith.constant 0 : index
    %c0_18 = arith.constant 0 : index
    %35 = vector.load %arg5[%c2, %c0_17, %c0_18] : memref<3x12x16xf32, #tpu.memory_space<vmem>>, vector<1x12x16xf32>
    %36 = vector.shape_cast %35 : vector<1x12x16xf32> to vector<12x16xf32>
    %cst_19 = arith.constant dense<0.000000e+00> : vector<128x16xf32>
    %37 = tpu.matmul %34, %36, %cst_19 {dimension_numbers = #tpu.dot_dimension_numbers<[1], [0], [0], [1], [0, 0, 1, 1], [], []>} : vector<128x12xf32>, vector<12x16xf32>, vector<128x16xf32> -> vector<128x16xf32>
    %38 = arith.addf %29, %37 : vector<128x16xf32>
    %c0_20 = arith.constant 0 : index
    %c0_21 = arith.constant 0 : index
    %39 = vector.load %arg9[%c0_20, %c0_21] : memref<1x16xf32, #tpu.memory_space<vmem>>, vector<1x16xf32>
    %40 = vector.broadcast %39 : vector<1x16xf32> to vector<128x16xf32>
    %41 = arith.addf %38, %40 : vector<128x16xf32>
    %42 = vector.shape_cast %41 : vector<128x16xf32> to vector<8x16x16xf32>
    %43 = vector.extract_strided_slice %42 {offsets = [0, 0, 0], sizes = [8, 16, 8], strides = [1, 1, 1]} : vector<8x16x16xf32> to vector<8x16x8xf32>
    %c0_22 = arith.constant 0 : index
    %c0_23 = arith.constant 0 : index
    %c0_24 = arith.constant 0 : index
    %c0_25 = arith.constant 0 : index
    %c0_26 = arith.constant 0 : index
    %44 = vector.load %arg10[%c0_22, %c0_23, %c0_24, %c0_25, %c0_26] : memref<1x8x2x16x8xf32, #tpu.memory_space<vmem>>, vector<1x8x1x16x8xf32>
    %45 = vector.shape_cast %44 : vector<1x8x1x16x8xf32> to vector<8x16x8xf32>
    %46 = vector.shape_cast %43 : vector<8x16x8xf32> to vector<1x8x1x16x8xf32>
    tpu.vector_store %arg10[%c0_22, %c0_23, %c0_24, %c0_25, %c0_26], %46 {strides = array<i32>} : memref<1x8x2x16x8xf32, #tpu.memory_space<vmem>>, vector<1x8x1x16x8xf32>,
    %47 = vector.extract_strided_slice %42 {offsets = [0, 0, 8], sizes = [8, 16, 8], strides = [1, 1, 1]} : vector<8x16x16xf32> to vector<8x16x8xf32>
    %c0_27 = arith.constant 0 : index
    %c0_28 = arith.constant 0 : index
    %c1_29 = arith.constant 1 : index
    %c0_30 = arith.constant 0 : index
    %c0_31 = arith.constant 0 : index
    %48 = vector.load %arg10[%c0_27, %c0_28, %c1_29, %c0_30, %c0_31] : memref<1x8x2x16x8xf32, #tpu.memory_space<vmem>>, vector<1x8x1x16x8xf32>
    %49 = vector.shape_cast %48 : vector<1x8x1x16x8xf32> to vector<8x16x8xf32>
    %50 = vector.shape_cast %47 : vector<8x16x8xf32> to vector<1x8x1x16x8xf32>
    tpu.vector_store %arg10[%c0_27, %c0_28, %c1_29, %c0_30, %c0_31], %50 {strides = array<i32>} : memref<1x8x2x16x8xf32, #tpu.memory_space<vmem>>, vector<1x8x1x16x8xf32>,
    %51 = vector.extract_strided_slice %6 {offsets = [0, 0, 0], sizes = [10, 1, 4], strides = [1, 1, 1]} : vector<10x16x4xf32> to vector<10x1x4xf32>
    %52 = vector.shape_cast %51 : vector<10x1x4xf32> to vector<10x4xf32>
    %53 = vector.extract_strided_slice %6 {offsets = [0, 15, 0], sizes = [10, 1, 4], strides = [1, 1, 1]} : vector<10x16x4xf32> to vector<10x1x4xf32>
    %54 = vector.shape_cast %53 : vector<10x1x4xf32> to vector<10x4xf32>
    %55 = vector.extract_strided_slice %52 {offsets = [0, 0], sizes = [8, 4], strides = [1, 1]} : vector<10x4xf32> to vector<8x4xf32>
    %56 = vector.extract_strided_slice %52 {offsets = [1, 0], sizes = [8, 4], strides = [1, 1]} : vector<10x4xf32> to vector<8x4xf32>
    %57 = vector.extract_strided_slice %52 {offsets = [2, 0], sizes = [8, 4], strides = [1, 1]} : vector<10x4xf32> to vector<8x4xf32>
    %58 = tpu.concatenate %55, %56, %57 in 1 : vector<8x4xf32>, vector<8x4xf32>, vector<8x4xf32> -> vector<8x12xf32>
    %c0_32 = arith.constant 0 : index
    %c0_33 = arith.constant 0 : index
    %c0_34 = arith.constant 0 : index
    %59 = vector.load %arg6[%c0_32, %c0_33, %c0_34] : memref<2x12x8xf32, #tpu.memory_space<vmem>>, vector<1x12x8xf32>
    %60 = vector.shape_cast %59 : vector<1x12x8xf32> to vector<12x8xf32>
    %cst_35 = arith.constant dense<0.000000e+00> : vector<8x8xf32>
    %61 = tpu.matmul %58, %60, %cst_35 {dimension_numbers = #tpu.dot_dimension_numbers<[1], [0], [0], [1], [0, 0, 1, 1], [], []>} : vector<8x12xf32>, vector<12x8xf32>, vector<8x8xf32> -> vector<8x8xf32>
    %62 = vector.extract_strided_slice %54 {offsets = [0, 0], sizes = [8, 4], strides = [1, 1]} : vector<10x4xf32> to vector<8x4xf32>
    %63 = vector.extract_strided_slice %54 {offsets = [1, 0], sizes = [8, 4], strides = [1, 1]} : vector<10x4xf32> to vector<8x4xf32>
    %64 = vector.extract_strided_slice %54 {offsets = [2, 0], sizes = [8, 4], strides = [1, 1]} : vector<10x4xf32> to vector<8x4xf32>
    %65 = tpu.concatenate %62, %63, %64 in 1 : vector<8x4xf32>, vector<8x4xf32>, vector<8x4xf32> -> vector<8x12xf32>
    %c1_36 = arith.constant 1 : index
    %c0_37 = arith.constant 0 : index
    %c0_38 = arith.constant 0 : index
    %66 = vector.load %arg6[%c1_36, %c0_37, %c0_38] : memref<2x12x8xf32, #tpu.memory_space<vmem>>, vector<1x12x8xf32>
    %67 = vector.shape_cast %66 : vector<1x12x8xf32> to vector<12x8xf32>
    %cst_39 = arith.constant dense<0.000000e+00> : vector<8x8xf32>
    %68 = tpu.matmul %65, %67, %cst_39 {dimension_numbers = #tpu.dot_dimension_numbers<[1], [0], [0], [1], [0, 0, 1, 1], [], []>} : vector<8x12xf32>, vector<12x8xf32>, vector<8x8xf32> -> vector<8x8xf32>
    %c0_40 = arith.constant 0 : index
    %c0_41 = arith.constant 0 : index
    %c0_42 = arith.constant 0 : index
    %c0_43 = arith.constant 0 : index
    %c0_44 = arith.constant 0 : index
    %69 = vector.load %arg10[%c0_40, %c0_41, %c0_42, %c0_43, %c0_44] : memref<1x8x2x16x8xf32, #tpu.memory_space<vmem>>, vector<1x8x1x1x4xf32>
    %70 = vector.shape_cast %69 : vector<1x8x1x1x4xf32> to vector<8x4xf32>
    %71 = vector.extract_strided_slice %61 {offsets = [0, 0], sizes = [8, 4], strides = [1, 1]} : vector<8x8xf32> to vector<8x4xf32>
    %72 = arith.subf %70, %71 : vector<8x4xf32>
    %c0_45 = arith.constant 0 : index
    %c0_46 = arith.constant 0 : index
    %c0_47 = arith.constant 0 : index
    %c0_48 = arith.constant 0 : index
    %c0_49 = arith.constant 0 : index
    %73 = vector.load %arg10[%c0_45, %c0_46, %c0_47, %c0_48, %c0_49] : memref<1x8x2x16x8xf32, #tpu.memory_space<vmem>>, vector<1x8x1x1x4xf32>
    %74 = vector.shape_cast %73 : vector<1x8x1x1x4xf32> to vector<8x4xf32>
    %75 = vector.shape_cast %72 : vector<8x4xf32> to vector<1x8x1x1x4xf32>
    tpu.vector_store %arg10[%c0_45, %c0_46, %c0_47, %c0_48, %c0_49], %75 {strides = array<i32>} : memref<1x8x2x16x8xf32, #tpu.memory_space<vmem>>, vector<1x8x1x1x4xf32>,
    %c0_50 = arith.constant 0 : index
    %c0_51 = arith.constant 0 : index
    %c1_52 = arith.constant 1 : index
    %c0_53 = arith.constant 0 : index
    %c0_54 = arith.constant 0 : index
    %76 = vector.load %arg10[%c0_50, %c0_51, %c1_52, %c0_53, %c0_54] : memref<1x8x2x16x8xf32, #tpu.memory_space<vmem>>, vector<1x8x1x1x4xf32>
    %77 = vector.shape_cast %76 : vector<1x8x1x1x4xf32> to vector<8x4xf32>
    %78 = vector.extract_strided_slice %61 {offsets = [0, 4], sizes = [8, 4], strides = [1, 1]} : vector<8x8xf32> to vector<8x4xf32>
    %79 = arith.subf %77, %78 : vector<8x4xf32>
    %c0_55 = arith.constant 0 : index
    %c0_56 = arith.constant 0 : index
    %c1_57 = arith.constant 1 : index
    %c0_58 = arith.constant 0 : index
    %c0_59 = arith.constant 0 : index
    %80 = vector.load %arg10[%c0_55, %c0_56, %c1_57, %c0_58, %c0_59] : memref<1x8x2x16x8xf32, #tpu.memory_space<vmem>>, vector<1x8x1x1x4xf32>
    %81 = vector.shape_cast %80 : vector<1x8x1x1x4xf32> to vector<8x4xf32>
    %82 = vector.shape_cast %79 : vector<8x4xf32> to vector<1x8x1x1x4xf32>
    tpu.vector_store %arg10[%c0_55, %c0_56, %c1_57, %c0_58, %c0_59], %82 {strides = array<i32>} : memref<1x8x2x16x8xf32, #tpu.memory_space<vmem>>, vector<1x8x1x1x4xf32>,
    %c0_60 = arith.constant 0 : index
    %c0_61 = arith.constant 0 : index
    %c0_62 = arith.constant 0 : index
    %c15 = arith.constant 15 : index
    %c4 = arith.constant 4 : index
    %83 = vector.load %arg10[%c0_60, %c0_61, %c0_62, %c15, %c4] : memref<1x8x2x16x8xf32, #tpu.memory_space<vmem>>, vector<1x8x1x1x4xf32>
    %84 = vector.shape_cast %83 : vector<1x8x1x1x4xf32> to vector<8x4xf32>
    %85 = vector.extract_strided_slice %68 {offsets = [0, 0], sizes = [8, 4], strides = [1, 1]} : vector<8x8xf32> to vector<8x4xf32>
    %86 = arith.subf %84, %85 : vector<8x4xf32>
    %c0_63 = arith.constant 0 : index
    %c0_64 = arith.constant 0 : index
    %c0_65 = arith.constant 0 : index
    %c15_66 = arith.constant 15 : index
    %c4_67 = arith.constant 4 : index
    %87 = vector.load %arg10[%c0_63, %c0_64, %c0_65, %c15_66, %c4_67] : memref<1x8x2x16x8xf32, #tpu.memory_space<vmem>>, vector<1x8x1x1x4xf32>
    %88 = vector.shape_cast %87 : vector<1x8x1x1x4xf32> to vector<8x4xf32>
    %89 = vector.shape_cast %86 : vector<8x4xf32> to vector<1x8x1x1x4xf32>
    tpu.vector_store %arg10[%c0_63, %c0_64, %c0_65, %c15_66, %c4_67], %89 {strides = array<i32>} : memref<1x8x2x16x8xf32, #tpu.memory_space<vmem>>, vector<1x8x1x1x4xf32>,
    %c0_68 = arith.constant 0 : index
    %c0_69 = arith.constant 0 : index
    %c1_70 = arith.constant 1 : index
    %c15_71 = arith.constant 15 : index
    %c4_72 = arith.constant 4 : index
    %90 = vector.load %arg10[%c0_68, %c0_69, %c1_70, %c15_71, %c4_72] : memref<1x8x2x16x8xf32, #tpu.memory_space<vmem>>, vector<1x8x1x1x4xf32>
    %91 = vector.shape_cast %90 : vector<1x8x1x1x4xf32> to vector<8x4xf32>
    %92 = vector.extract_strided_slice %68 {offsets = [0, 4], sizes = [8, 4], strides = [1, 1]} : vector<8x8xf32> to vector<8x4xf32>
    %93 = arith.subf %91, %92 : vector<8x4xf32>
    %c0_73 = arith.constant 0 : index
    %c0_74 = arith.constant 0 : index
    %c1_75 = arith.constant 1 : index
    %c15_76 = arith.constant 15 : index
    %c4_77 = arith.constant 4 : index
    %94 = vector.load %arg10[%c0_73, %c0_74, %c1_75, %c15_76, %c4_77] : memref<1x8x2x16x8xf32, #tpu.memory_space<vmem>>, vector<1x8x1x1x4xf32>
    %95 = vector.shape_cast %94 : vector<1x8x1x1x4xf32> to vector<8x4xf32>
    %96 = vector.shape_cast %93 : vector<8x4xf32> to vector<1x8x1x1x4xf32>
    tpu.vector_store %arg10[%c0_73, %c0_74, %c1_75, %c15_76, %c4_77], %96 {strides = array<i32>} : memref<1x8x2x16x8xf32, #tpu.memory_space<vmem>>, vector<1x8x1x1x4xf32>,
    %c0_i32 = arith.constant 0 : i32
    %97 = arith.cmpi eq, %arg1, %c0_i32 : i32
    %98 = arith.extui %97 : i1 to i32
    %c0_i32_78 = arith.constant 0 : i32
    %99 = arith.cmpi ne, %98, %c0_i32_78 : i32
    scf.if %99 {
      %103 = vector.extract_strided_slice %6 {offsets = [1, 0, 0], sizes = [1, 16, 4], strides = [1, 1, 1]} : vector<10x16x4xf32> to vector<1x16x4xf32>
      %104 = vector.shape_cast %103 : vector<1x16x4xf32> to vector<16x4xf32>
      %105 = vector.extract_strided_slice %104 {offsets = [0, 0], sizes = [1, 4], strides = [1, 1]} : vector<16x4xf32> to vector<1x4xf32>
      %106 = vector.extract_strided_slice %104 {offsets = [0, 0], sizes = [15, 4], strides = [1, 1]} : vector<16x4xf32> to vector<15x4xf32>
      %107 = tpu.concatenate %105, %106 in 0 : vector<1x4xf32>, vector<15x4xf32> -> vector<16x4xf32>
      %108 = vector.extract_strided_slice %104 {offsets = [1, 0], sizes = [15, 4], strides = [1, 1]} : vector<16x4xf32> to vector<15x4xf32>
      %109 = vector.extract_strided_slice %104 {offsets = [15, 0], sizes = [1, 4], strides = [1, 1]} : vector<16x4xf32> to vector<1x4xf32>
      %110 = tpu.concatenate %108, %109 in 0 : vector<15x4xf32>, vector<1x4xf32> -> vector<16x4xf32>
      %111 = tpu.concatenate %107, %104, %110 in 1 : vector<16x4xf32>, vector<16x4xf32>, vector<16x4xf32> -> vector<16x12xf32>
      %c0_80 = arith.constant 0 : index
      %c0_81 = arith.constant 0 : index
      %c0_82 = arith.constant 0 : index
      %112 = vector.load %arg7[%c0_80, %c0_81, %c0_82] : memref<2x12x8xf32, #tpu.memory_space<vmem>>, vector<1x12x8xf32>
      %113 = vector.shape_cast %112 : vector<1x12x8xf32> to vector<12x8xf32>
      %cst_83 = arith.constant dense<0.000000e+00> : vector<16x8xf32>
      %114 = tpu.matmul %111, %113, %cst_83 {dimension_numbers = #tpu.dot_dimension_numbers<[1], [0], [0], [1], [0, 0, 1, 1], [], []>} : vector<16x12xf32>, vector<12x8xf32>, vector<16x8xf32> -> vector<16x8xf32>
      %c0_84 = arith.constant 0 : index
      %c0_85 = arith.constant 0 : index
      %c0_86 = arith.constant 0 : index
      %c0_87 = arith.constant 0 : index
      %c0_88 = arith.constant 0 : index
      %115 = vector.load %arg10[%c0_84, %c0_85, %c0_86, %c0_87, %c0_88] : memref<1x8x2x16x8xf32, #tpu.memory_space<vmem>>, vector<1x1x1x16x8xf32>
      %116 = vector.shape_cast %115 : vector<1x1x1x16x8xf32> to vector<16x8xf32>
      %117 = arith.subf %116, %114 : vector<16x8xf32>
      %c0_89 = arith.constant 0 : index
      %c0_90 = arith.constant 0 : index
      %c0_91 = arith.constant 0 : index
      %c0_92 = arith.constant 0 : index
      %c0_93 = arith.constant 0 : index
      %118 = vector.load %arg10[%c0_89, %c0_90, %c0_91, %c0_92, %c0_93] : memref<1x8x2x16x8xf32, #tpu.memory_space<vmem>>, vector<1x1x1x16x8xf32>
      %119 = vector.shape_cast %118 : vector<1x1x1x16x8xf32> to vector<16x8xf32>
      %120 = vector.shape_cast %117 : vector<16x8xf32> to vector<1x1x1x16x8xf32>
      tpu.vector_store %arg10[%c0_89, %c0_90, %c0_91, %c0_92, %c0_93], %120 {strides = array<i32>} : memref<1x8x2x16x8xf32, #tpu.memory_space<vmem>>, vector<1x1x1x16x8xf32>,
      %121 = vector.extract_strided_slice %104 {offsets = [0, 0], sizes = [1, 4], strides = [1, 1]} : vector<16x4xf32> to vector<1x4xf32>
      %c0_94 = arith.constant 0 : index
      %c0_95 = arith.constant 0 : index
      %c0_96 = arith.constant 0 : index
      %c0_97 = arith.constant 0 : index
      %122 = vector.load %arg8[%c0_94, %c0_95, %c0_96, %c0_97] : memref<2x2x4x4xf32, #tpu.memory_space<vmem>>, vector<1x1x4x4xf32>
      %123 = vector.shape_cast %122 : vector<1x1x4x4xf32> to vector<4x4xf32>
      %cst_98 = arith.constant dense<0.000000e+00> : vector<1x4xf32>
      %124 = tpu.matmul %121, %123, %cst_98 {dimension_numbers = #tpu.dot_dimension_numbers<[1], [0], [0], [1], [0, 0, 1, 1], [], []>} : vector<1x4xf32>, vector<4x4xf32>, vector<1x4xf32> -> vector<1x4xf32>
      %125 = vector.extract_strided_slice %104 {offsets = [15, 0], sizes = [1, 4], strides = [1, 1]} : vector<16x4xf32> to vector<1x4xf32>
      %c0_99 = arith.constant 0 : index
      %c1_100 = arith.constant 1 : index
      %c0_101 = arith.constant 0 : index
      %c0_102 = arith.constant 0 : index
      %126 = vector.load %arg8[%c0_99, %c1_100, %c0_101, %c0_102] : memref<2x2x4x4xf32, #tpu.memory_space<vmem>>, vector<1x1x4x4xf32>
      %127 = vector.shape_cast %126 : vector<1x1x4x4xf32> to vector<4x4xf32>
      %cst_103 = arith.constant dense<0.000000e+00> : vector<1x4xf32>
      %128 = tpu.matmul %125, %127, %cst_103 {dimension_numbers = #tpu.dot_dimension_numbers<[1], [0], [0], [1], [0, 0, 1, 1], [], []>} : vector<1x4xf32>, vector<4x4xf32>, vector<1x4xf32> -> vector<1x4xf32>
      %c0_104 = arith.constant 0 : index
      %c0_105 = arith.constant 0 : index
      %c0_106 = arith.constant 0 : index
      %c0_107 = arith.constant 0 : index
      %c0_108 = arith.constant 0 : index
      %129 = vector.load %arg10[%c0_104, %c0_105, %c0_106, %c0_107, %c0_108] : memref<1x8x2x16x8xf32, #tpu.memory_space<vmem>>, vector<1x1x1x1x4xf32>
      %130 = vector.shape_cast %129 : vector<1x1x1x1x4xf32> to vector<1x4xf32>
      %131 = arith.addf %130, %124 : vector<1x4xf32>
      %c0_109 = arith.constant 0 : index
      %c0_110 = arith.constant 0 : index
      %c0_111 = arith.constant 0 : index
      %c0_112 = arith.constant 0 : index
      %c0_113 = arith.constant 0 : index
      %132 = vector.load %arg10[%c0_109, %c0_110, %c0_111, %c0_112, %c0_113] : memref<1x8x2x16x8xf32, #tpu.memory_space<vmem>>, vector<1x1x1x1x4xf32>
      %133 = vector.shape_cast %132 : vector<1x1x1x1x4xf32> to vector<1x4xf32>
      %134 = vector.shape_cast %131 : vector<1x4xf32> to vector<1x1x1x1x4xf32>
      tpu.vector_store %arg10[%c0_109, %c0_110, %c0_111, %c0_112, %c0_113], %134 {strides = array<i32>} : memref<1x8x2x16x8xf32, #tpu.memory_space<vmem>>, vector<1x1x1x1x4xf32>,
      %c0_114 = arith.constant 0 : index
      %c0_115 = arith.constant 0 : index
      %c0_116 = arith.constant 0 : index
      %c15_117 = arith.constant 15 : index
      %c4_118 = arith.constant 4 : index
      %135 = vector.load %arg10[%c0_114, %c0_115, %c0_116, %c15_117, %c4_118] : memref<1x8x2x16x8xf32, #tpu.memory_space<vmem>>, vector<1x1x1x1x4xf32>
      %136 = vector.shape_cast %135 : vector<1x1x1x1x4xf32> to vector<1x4xf32>
      %137 = arith.addf %136, %128 : vector<1x4xf32>
      %c0_119 = arith.constant 0 : index
      %c0_120 = arith.constant 0 : index
      %c0_121 = arith.constant 0 : index
      %c15_122 = arith.constant 15 : index
      %c4_123 = arith.constant 4 : index
      %138 = vector.load %arg10[%c0_119, %c0_120, %c0_121, %c15_122, %c4_123] : memref<1x8x2x16x8xf32, #tpu.memory_space<vmem>>, vector<1x1x1x1x4xf32>
      %139 = vector.shape_cast %138 : vector<1x1x1x1x4xf32> to vector<1x4xf32>
      %140 = vector.shape_cast %137 : vector<1x4xf32> to vector<1x1x1x1x4xf32>
      tpu.vector_store %arg10[%c0_119, %c0_120, %c0_121, %c15_122, %c4_123], %140 {strides = array<i32>} : memref<1x8x2x16x8xf32, #tpu.memory_space<vmem>>, vector<1x1x1x1x4xf32>,
    } else {
    }
    %c1_i32 = arith.constant 1 : i32
    %100 = arith.cmpi eq, %arg1, %c1_i32 : i32
    %101 = arith.extui %100 : i1 to i32
    %c0_i32_79 = arith.constant 0 : i32
    %102 = arith.cmpi ne, %101, %c0_i32_79 : i32
    scf.if %102 {
      %103 = vector.extract_strided_slice %6 {offsets = [8, 0, 0], sizes = [1, 16, 4], strides = [1, 1, 1]} : vector<10x16x4xf32> to vector<1x16x4xf32>
      %104 = vector.shape_cast %103 : vector<1x16x4xf32> to vector<16x4xf32>
      %105 = vector.extract_strided_slice %104 {offsets = [0, 0], sizes = [1, 4], strides = [1, 1]} : vector<16x4xf32> to vector<1x4xf32>
      %106 = vector.extract_strided_slice %104 {offsets = [0, 0], sizes = [15, 4], strides = [1, 1]} : vector<16x4xf32> to vector<15x4xf32>
      %107 = tpu.concatenate %105, %106 in 0 : vector<1x4xf32>, vector<15x4xf32> -> vector<16x4xf32>
      %108 = vector.extract_strided_slice %104 {offsets = [1, 0], sizes = [15, 4], strides = [1, 1]} : vector<16x4xf32> to vector<15x4xf32>
      %109 = vector.extract_strided_slice %104 {offsets = [15, 0], sizes = [1, 4], strides = [1, 1]} : vector<16x4xf32> to vector<1x4xf32>
      %110 = tpu.concatenate %108, %109 in 0 : vector<15x4xf32>, vector<1x4xf32> -> vector<16x4xf32>
      %111 = tpu.concatenate %107, %104, %110 in 1 : vector<16x4xf32>, vector<16x4xf32>, vector<16x4xf32> -> vector<16x12xf32>
      %c1_80 = arith.constant 1 : index
      %c0_81 = arith.constant 0 : index
      %c0_82 = arith.constant 0 : index
      %112 = vector.load %arg7[%c1_80, %c0_81, %c0_82] : memref<2x12x8xf32, #tpu.memory_space<vmem>>, vector<1x12x8xf32>
      %113 = vector.shape_cast %112 : vector<1x12x8xf32> to vector<12x8xf32>
      %cst_83 = arith.constant dense<0.000000e+00> : vector<16x8xf32>
      %114 = tpu.matmul %111, %113, %cst_83 {dimension_numbers = #tpu.dot_dimension_numbers<[1], [0], [0], [1], [0, 0, 1, 1], [], []>} : vector<16x12xf32>, vector<12x8xf32>, vector<16x8xf32> -> vector<16x8xf32>
      %c0_84 = arith.constant 0 : index
      %c7 = arith.constant 7 : index
      %c1_85 = arith.constant 1 : index
      %c0_86 = arith.constant 0 : index
      %c0_87 = arith.constant 0 : index
      %115 = vector.load %arg10[%c0_84, %c7, %c1_85, %c0_86, %c0_87] : memref<1x8x2x16x8xf32, #tpu.memory_space<vmem>>, vector<1x1x1x16x8xf32>
      %116 = vector.shape_cast %115 : vector<1x1x1x16x8xf32> to vector<16x8xf32>
      %117 = arith.subf %116, %114 : vector<16x8xf32>
      %c0_88 = arith.constant 0 : index
      %c7_89 = arith.constant 7 : index
      %c1_90 = arith.constant 1 : index
      %c0_91 = arith.constant 0 : index
      %c0_92 = arith.constant 0 : index
      %118 = vector.load %arg10[%c0_88, %c7_89, %c1_90, %c0_91, %c0_92] : memref<1x8x2x16x8xf32, #tpu.memory_space<vmem>>, vector<1x1x1x16x8xf32>
      %119 = vector.shape_cast %118 : vector<1x1x1x16x8xf32> to vector<16x8xf32>
      %120 = vector.shape_cast %117 : vector<16x8xf32> to vector<1x1x1x16x8xf32>
      tpu.vector_store %arg10[%c0_88, %c7_89, %c1_90, %c0_91, %c0_92], %120 {strides = array<i32>} : memref<1x8x2x16x8xf32, #tpu.memory_space<vmem>>, vector<1x1x1x16x8xf32>,
      %121 = vector.extract_strided_slice %104 {offsets = [0, 0], sizes = [1, 4], strides = [1, 1]} : vector<16x4xf32> to vector<1x4xf32>
      %c1_93 = arith.constant 1 : index
      %c0_94 = arith.constant 0 : index
      %c0_95 = arith.constant 0 : index
      %c0_96 = arith.constant 0 : index
      %122 = vector.load %arg8[%c1_93, %c0_94, %c0_95, %c0_96] : memref<2x2x4x4xf32, #tpu.memory_space<vmem>>, vector<1x1x4x4xf32>
      %123 = vector.shape_cast %122 : vector<1x1x4x4xf32> to vector<4x4xf32>
      %cst_97 = arith.constant dense<0.000000e+00> : vector<1x4xf32>
      %124 = tpu.matmul %121, %123, %cst_97 {dimension_numbers = #tpu.dot_dimension_numbers<[1], [0], [0], [1], [0, 0, 1, 1], [], []>} : vector<1x4xf32>, vector<4x4xf32>, vector<1x4xf32> -> vector<1x4xf32>
      %125 = vector.extract_strided_slice %104 {offsets = [15, 0], sizes = [1, 4], strides = [1, 1]} : vector<16x4xf32> to vector<1x4xf32>
      %c1_98 = arith.constant 1 : index
      %c1_99 = arith.constant 1 : index
      %c0_100 = arith.constant 0 : index
      %c0_101 = arith.constant 0 : index
      %126 = vector.load %arg8[%c1_98, %c1_99, %c0_100, %c0_101] : memref<2x2x4x4xf32, #tpu.memory_space<vmem>>, vector<1x1x4x4xf32>
      %127 = vector.shape_cast %126 : vector<1x1x4x4xf32> to vector<4x4xf32>
      %cst_102 = arith.constant dense<0.000000e+00> : vector<1x4xf32>
      %128 = tpu.matmul %125, %127, %cst_102 {dimension_numbers = #tpu.dot_dimension_numbers<[1], [0], [0], [1], [0, 0, 1, 1], [], []>} : vector<1x4xf32>, vector<4x4xf32>, vector<1x4xf32> -> vector<1x4xf32>
      %c0_103 = arith.constant 0 : index
      %c7_104 = arith.constant 7 : index
      %c1_105 = arith.constant 1 : index
      %c0_106 = arith.constant 0 : index
      %c0_107 = arith.constant 0 : index
      %129 = vector.load %arg10[%c0_103, %c7_104, %c1_105, %c0_106, %c0_107] : memref<1x8x2x16x8xf32, #tpu.memory_space<vmem>>, vector<1x1x1x1x4xf32>
      %130 = vector.shape_cast %129 : vector<1x1x1x1x4xf32> to vector<1x4xf32>
      %131 = arith.addf %130, %124 : vector<1x4xf32>
      %c0_108 = arith.constant 0 : index
      %c7_109 = arith.constant 7 : index
      %c1_110 = arith.constant 1 : index
      %c0_111 = arith.constant 0 : index
      %c0_112 = arith.constant 0 : index
      %132 = vector.load %arg10[%c0_108, %c7_109, %c1_110, %c0_111, %c0_112] : memref<1x8x2x16x8xf32, #tpu.memory_space<vmem>>, vector<1x1x1x1x4xf32>
      %133 = vector.shape_cast %132 : vector<1x1x1x1x4xf32> to vector<1x4xf32>
      %134 = vector.shape_cast %131 : vector<1x4xf32> to vector<1x1x1x1x4xf32>
      tpu.vector_store %arg10[%c0_108, %c7_109, %c1_110, %c0_111, %c0_112], %134 {strides = array<i32>} : memref<1x8x2x16x8xf32, #tpu.memory_space<vmem>>, vector<1x1x1x1x4xf32>,
      %c0_113 = arith.constant 0 : index
      %c7_114 = arith.constant 7 : index
      %c1_115 = arith.constant 1 : index
      %c15_116 = arith.constant 15 : index
      %c4_117 = arith.constant 4 : index
      %135 = vector.load %arg10[%c0_113, %c7_114, %c1_115, %c15_116, %c4_117] : memref<1x8x2x16x8xf32, #tpu.memory_space<vmem>>, vector<1x1x1x1x4xf32>
      %136 = vector.shape_cast %135 : vector<1x1x1x1x4xf32> to vector<1x4xf32>
      %137 = arith.addf %136, %128 : vector<1x4xf32>
      %c0_118 = arith.constant 0 : index
      %c7_119 = arith.constant 7 : index
      %c1_120 = arith.constant 1 : index
      %c15_121 = arith.constant 15 : index
      %c4_122 = arith.constant 4 : index
      %138 = vector.load %arg10[%c0_118, %c7_119, %c1_120, %c15_121, %c4_122] : memref<1x8x2x16x8xf32, #tpu.memory_space<vmem>>, vector<1x1x1x1x4xf32>
      %139 = vector.shape_cast %138 : vector<1x1x1x1x4xf32> to vector<1x4xf32>
      %140 = vector.shape_cast %137 : vector<1x4xf32> to vector<1x1x1x1x4xf32>
      tpu.vector_store %arg10[%c0_118, %c7_119, %c1_120, %c15_121, %c4_122], %140 {strides = array<i32>} : memref<1x8x2x16x8xf32, #tpu.memory_space<vmem>>, vector<1x1x1x1x4xf32>,
    } else {
    }
    return
  }
  func.func @transform_0(%arg0: i32, %arg1: i32) -> (i32, i32, i32, i32) {
    %c0_i32 = arith.constant 0 : i32
    %c0_i32_0 = arith.constant 0 : i32
    %c0_i32_1 = arith.constant 0 : i32
    return %arg0, %arg1, %c0_i32, %c0_i32_0 : i32, i32, i32, i32
  }
  func.func @transform_1(%arg0: i32, %arg1: i32) -> (i32, i32, i32, i32) {
    %c8_i32 = arith.constant 8 : i32
    %0 = arith.muli %arg1, %c8_i32 : i32
    %c1_i32 = arith.constant 1 : i32
    %1 = arith.subi %0, %c1_i32 : i32
    %c0_i32 = arith.constant 0 : i32
    %2 = arith.maxsi %1, %c0_i32 : i32
    %c0_i32_0 = arith.constant 0 : i32
    %c0_i32_1 = arith.constant 0 : i32
    %c0_i32_2 = arith.constant 0 : i32
    return %arg0, %2, %c0_i32_0, %c0_i32_1 : i32, i32, i32, i32
  }
  func.func @transform_2(%arg0: i32, %arg1: i32) -> (i32, i32, i32, i32) {
    %c1_i32 = arith.constant 1 : i32
    %0 = arith.addi %arg1, %c1_i32 : i32
    %c8_i32 = arith.constant 8 : i32
    %1 = arith.muli %0, %c8_i32 : i32
    %c15_i32 = arith.constant 15 : i32
    %2 = arith.minsi %1, %c15_i32 : i32
    %c0_i32 = arith.constant 0 : i32
    %c0_i32_0 = arith.constant 0 : i32
    %c0_i32_1 = arith.constant 0 : i32
    return %arg0, %2, %c0_i32, %c0_i32_0 : i32, i32, i32, i32
  }
  func.func @transform_3(%arg0: i32, %arg1: i32) -> (i32, i32, i32) {
    %c0_i32 = arith.constant 0 : i32
    %c0_i32_0 = arith.constant 0 : i32
    %c0_i32_1 = arith.constant 0 : i32
    %c0_i32_2 = arith.constant 0 : i32
    return %c0_i32, %c0_i32_0, %c0_i32_1 : i32, i32, i32
  }
  func.func @transform_4(%arg0: i32, %arg1: i32) -> (i32, i32, i32) {
    %c0_i32 = arith.constant 0 : i32
    %c0_i32_0 = arith.constant 0 : i32
    %c0_i32_1 = arith.constant 0 : i32
    %c0_i32_2 = arith.constant 0 : i32
    return %c0_i32, %c0_i32_0, %c0_i32_1 : i32, i32, i32
  }
  func.func @transform_5(%arg0: i32, %arg1: i32) -> (i32, i32, i32) {
    %c0_i32 = arith.constant 0 : i32
    %c0_i32_0 = arith.constant 0 : i32
    %c0_i32_1 = arith.constant 0 : i32
    %c0_i32_2 = arith.constant 0 : i32
    return %c0_i32, %c0_i32_0, %c0_i32_1 : i32, i32, i32
  }
  func.func @transform_6(%arg0: i32, %arg1: i32) -> (i32, i32, i32, i32) {
    %c0_i32 = arith.constant 0 : i32
    %c0_i32_0 = arith.constant 0 : i32
    %c0_i32_1 = arith.constant 0 : i32
    %c0_i32_2 = arith.constant 0 : i32
    %c0_i32_3 = arith.constant 0 : i32
    return %c0_i32, %c0_i32_0, %c0_i32_1, %c0_i32_2 : i32, i32, i32, i32
  }
  func.func @transform_7(%arg0: i32, %arg1: i32) -> (i32, i32) {
    %c0_i32 = arith.constant 0 : i32
    %c0_i32_0 = arith.constant 0 : i32
    %c0_i32_1 = arith.constant 0 : i32
    return %c0_i32, %c0_i32_0 : i32, i32
  }
  func.func @transform_8(%arg0: i32, %arg1: i32) -> (i32, i32, i32, i32, i32) {
    %c0_i32 = arith.constant 0 : i32
    %c0_i32_0 = arith.constant 0 : i32
    %c0_i32_1 = arith.constant 0 : i32
    %c0_i32_2 = arith.constant 0 : i32
    return %arg0, %arg1, %c0_i32, %c0_i32_0, %c0_i32_1 : i32, i32, i32, i32, i32
  }
}

</mosaic_0001>

<bundles_post_ra>
// kernel: tpu_custom_call.1
= control target key start
LH: loop header
LB: loop body
LE: loop exit
PB: predicated region body
PF: predicated region fallthrough
CT: control target
= control target key end

     0   :  { %s3503_s27 = smov 0   ;;  %s3505_s28 = smov 0   ;;  %s4775_s0 = inlined_call_operand.vmem [shape: f32[2,16,16,4], index: 0, kind: input, shape index: {}]   ;;  %s4776_s1 = inlined_call_operand.vmem [shape: f32[2,16,16,4], index: 1, kind: input, shape index: {}]   ;;  %s4777_s2 = inlined_call_operand.vmem [shape: f32[2,16,16,4], index: 2, kind: input, shape index: {}]   ;;  %s4778_s3 = inlined_call_operand.vmem [shape: f32[3,12,16], index: 3, kind: input, shape index: {}]   ;;  %s4779_s4 = inlined_call_operand.vmem [shape: f32[2,12,8], index: 4, kind: input, shape index: {}]   ;;  %s4780_s5 = inlined_call_operand.vmem [shape: f32[2,12,8], index: 5, kind: input, shape index: {}]   ;;  %s4781_s6 = inlined_call_operand.vmem [shape: f32[2,2,4,4], index: 6, kind: input, shape index: {}]   ;;  %s4782_s7 = inlined_call_operand.vmem [shape: f32[1,16], index: 7, kind: input, shape index: {}]   ;;  %s4783_s8 = inlined_call_operand.vmem [shape: f32[2,16,2,16,8], index: 8, kind: output, shape index: {}]  }
   0x1   :  { %s3507_s29 = smov 0   ;;  %s3509_s30 = smov 0  }
   0x2   :  { %s3511_s9 = smov 0  }
   0x3 LB: > { %s27_s10 = sadd.s32 1, %s3433_s29  ;;  %s30_s11 = sadd.s32 1, %s3437_s30  ;;  %s3441_s9 = sphi %s3511_s9, %s18_s9   ;;  %s3437_s30 = sphi %s3509_s30, %s4830_s30   ;;  %s3433_s29 = sphi %s3507_s29, %s4829_s29   ;;  %s3429_s28 = sphi %s3505_s28, %s4828_s28   ;;  %s3425_s27 = sphi %s3503_s27, %s4827_s27  }
   0x4   : > { %p28_p0 = scmp.ge.s32.totalorder %s27_s10, 2  ;;  %p2893_p1 = scmp.ge.s32.totalorder %s3441_s9, 1 }
   0x5   : > { %p348_p2 = scmp.lt.s32.totalorder %s3441_s9, 5 }
   0x6   : > { %s4832_s10 = smov (%p28_p0, %s27_s10), 0  ;;  %s4834_s11 = smov (!%p28_p0, %s30_s11), %s3437_s30 }
   0x7   : > { %p349_p3 = pnand %p2893_p1, %p348_p2  ;;  %p32_p4 = scmp.ge.s32.totalorder %s4834_s11, 2 }
   0x9   : > { %s4836_s11 = smov (%p32_p4, %s4834_s11), 0  ;;  %352 = sbr.rel (%p349_p3) target bundleno = 1378 (0x562), region = 52 }
  0x10   : > { %s3536_s12 = sshll.u32 %s3425_s27, 3  ;;  %p419_p5 = scmp.lt.s32.totalorder %s3429_s28, 1  ;;  %v771_v0 = vld [vmem:[%s4778_s3] sm:$0xff]  ;;  %v772_v1 = vld [vmem:[%s4778_s3 + $0x8] sm:$0xf]  ;;  %vm953_vm0 = vcmask 1043456  }
  0x11   : > { %p421_p6 = scmp.lt.s32.totalorder %s3536_s12, 15  ;;  %v3545_v2 = vpack.c.bf16 %v772_v1, %v771_v0  ;;  %vm3443_vm1 = vmmov 1   ;;  %vm514_vm3 = vcmask 1040384   ;;  %s3444_s15 = smov 8   ;;  %vm1770_vm4 = vcmask 1041409   ;;  %v2919_v27 = vld [vmem:[%s4778_s3 + $0x10] sm:$0xff] }
  0x12   : > { %s4838_s28 = smov (!%p419_p5, %s3429_s28), 1  ;;  %vm3549_vm2 = vmpackc.low %vm953_vm0, %vm3443_vm1  ;;  %s3445_s16 = smov 4   ;;  %v2920_v28 = vld [vmem:[%s4778_s3 + $0x18] sm:$0xf]  ;;  %vm573_vm5 = vcmask 1046528   ;;  %v2955_v54 = vld [vmem:[%s4778_s3 + $0x20] sm:$0xff] }
  0x13   : > { %s422_s17 = scalar_select %p421_p6, %s3536_s12, 15  ;;  %3284 = vmatprep.subr.msk.bf16.mxu0 %vm3549_vm2, %v3545_v2  ;;  %v3276_v29 = vpack.c.bf16 %v2920_v28, %v2919_v27  ;;  %v2956_v55 = vld [vmem:[%s4778_s3 + $0x28] sm:$0xf]  ;;  %vm1773_vm6 = vcmask 1042434   ;;  %vm1776_vm7 = vcmask 1043459   ;;  %vm1779_vm8 = vcmask 1044484  }
  0x14   : > { %s3553_s18 = sshll.u32 %s4838_s28, 5  ;;  %s2917_s19 = sshll.u32 %s4838_s28, 6  ;;  %3287 = vmatpush3.bf16.msk.msra.mxu0 %vm3549_vm2, %v3545_v2  ;;  %v3807_v58 = vpack.c.bf16 %v2956_v55, %v2955_v54  ;;  %vm1782_vm9 = vcmask 1045509   ;;  %vm1785_vm10 = vcmask 1046534   ;;  %vm1787_vm11 = vcmask 1047559  }
  0x15   : > { %s2895_s20 = sshll.u32 %s422_s17, 1  ;;  %s2916_s21 = sshll.u32 %s422_s17, 2  ;;  %3278 = vmatprep.subr.msk.bf16.mxu1 %vm3549_vm2, %v3276_v29  ;;  %vm737_vm12 = vcmask 31744   ;;  %vm754_vm13 = vcmask 64512   ;;  %vm904_vm14 = vcmask 97280   ;;  %vm3447_vm15 = vmmov 0  }
  0x16   : > { %s425_s22 = sadd.s32 %s3553_s18, %s2895_s20  ;;  %s3562_s23 = sadd.s32 %s2917_s19, %s2916_s21  ;;  %3281 = vmatpush3.bf16.msk.msra.mxu1 %vm3549_vm2, %v3276_v29  ;;  %3290 = vmatprep.subr.msk.bf16.mxu0 %vm3549_vm2, %v3807_v58  ;;  %vm2060_vm1 = vcmask 24576  }
  0x17   : > { %s2897_s24 = sshll.u32 %s425_s22, 3  ;;  %s2899_s28 = sadd.s32 4294967295, %s3536_s12  ;;  %3314 = vmatprep.subr.msk.bf16.mxu1 %vm3549_vm2, %v3545_v2 }
  0x18   : > { %s3567_s13 = scalar_lea.vmem %s4775_s0, %s2897_s24  ;;  %p431_p7 = scmp.gt.s32.totalorder %s2899_s28, 0 }
  0x19   : > { %v3570_v4 = vld [vmem:[%s3567_s13 + $0x10] sm:$0xff]  ;;  %v3574_v5 = vld [vmem:[%s3567_s13] sm:$0xff]  ;;  %v3577_v6 = vld [vmem:[%s3567_s13 + $0x18] sm:$0xff]  ;;  %p2900_p8 = scmp.lt.s32.totalorder %s2899_s28, 15  ;;  %s3067_s17 = sadd.s32 8, %s3536_s12 }
  0x1a   : > { %4800 = vst [vmem:[#allocation2_spill] sm:$0xff] %v3574_v5  ;;  %v3580_v7 = vrot.slane %v3570_v4, 7  ;;  %v518_v8 = vrot.slane %v3574_v5, 7  ;;  %v4784_v9 = vrot.slane %v3577_v6, 7  ;;  %v3585_v10 = vld [vmem:[%s3567_s13 + $0x8] sm:$0xff]  ;;  %v1900_v11 = vrot.slane %v3577_v6, 6 }
  0x1b   : > { %s432_s14 = scalar_select %p431_p7, %s2899_s28, 0  ;;  %v3598_v14 = vrot.slane %v3585_v10, 7  ;;  %v3621_v18 = vld [vmem:[%s3567_s13 + $0x28] sm:$0xff]  ;;  %v3624_v19 = vld [vmem:[%s3567_s13 + $0x20] sm:$0xff]  ;;  %v3669_v26 = vld [vmem:[%s3567_s13 + $0x30] sm:$0xff]  ;;  %v577_v52 = vrot.slane %v3574_v5, 1 }
  0x1c   : > { %v3591_v12 = vsel %vm514_vm3, %v3570_v4, %v3580_v7  ;;  %v3595_v13 = vsel %vm514_vm3, %v3574_v5, %v518_v8  ;;  %v3610_v15 = vsel %vm514_vm3, %v3580_v7, %v4784_v9  ;;  %p3631_p9 = scmp.lt.s32.totalorder %s3067_s17, 15  ;;  %v3636_v20 = vrot.slane %v3624_v19, 7  ;;  %v3704_v32 = vld [vmem:[%s3567_s13 + $0x38] sm:$0xff]  ;;  %v3719_v35 = vld [vmem:[%s3567_s13 + $0x40] sm:$0xff]  ;;  %v3735_v38 = vld [vmem:[%s3567_s13 + $0x48] sm:$0xff]  ;;  %s2918_s22 = sshll.u32 %s3562_s23, 3 }
  0x1d   : > { %4801 = vst [vmem:[#allocation3_spill] sm:$0xff] %v3595_v13  ;;  %4802 = vst [vmem:[#allocation4_spill] sm:$0xff] %v3598_v14  ;;  %689 = vrot.lane.b32.xlu1 %v3591_v12, %s3444_s15  ;;  %640 = vrot.lane.b32.xlu0 %v3595_v13, %s3445_s16  ;;  %s4840_s14 = smov (!%p2900_p8, %s432_s14), 15  ;;  %v3614_v16 = vsel %vm514_vm3, %v518_v8, %v3598_v14  ;;  %v3618_v17 = vsel %vm1770_vm4, %v1900_v11, %v3598_v14  ;;  %v525_v21 = vrot.slane %v3621_v18, 7  ;;  %v3750_v41 = vld [vmem:[%s3567_s13 + $0x50] sm:$0xff]  ;;  %v3769_v44 = vld [vmem:[%s3567_s13 + $0x58] sm:$0xff] }
  0x1e   : > { %4803 = vst [vmem:[#allocation5_spill] sm:$0xff] %v3614_v16  ;;  %s2905_s12 = sshll.u32 %s4840_s14, 1  ;;  %s4842_s17 = smov (!%p3631_p9, %s3067_s17), 15  ;;  %v3666_v25 = vsel %vm514_vm3, %v3624_v19, %v3636_v20  ;;  %v527_v30 = vrot.slane %v3669_v26, 7  ;;  %v528_v33 = vrot.slane %v3704_v32, 7  ;;  %v530_v36 = vrot.slane %v3719_v35, 7 }
  0x1f   : > { %s439_s19 = sadd.s32 %s2905_s12, %s3553_s18  ;;  %v3661_v24 = vsel %vm514_vm3, %v3636_v20, %v525_v21  ;;  %s4844_s17 = smov (!%p3631_p9, %s4842_s17), 15  ;;  %v531_v39 = vrot.slane %v3735_v38, 7  ;;  %v533_v42 = vrot.slane %v3750_v41, 7  ;;  %v534_v45 = vrot.slane %v3769_v44, 7  ;;  %v3825_v62 = vld [vmem:[%s3567_s13 + $0x60] sm:$0xff]  ;;  %v3830_v1 = vld [vmem:[%s3567_s13 + $0x70] sm:$0xff] }
  0x20   : > { %s2907_s21 = sshll.u32 %s439_s19, 3  ;;  %s3683_s19 = sshll.u32 %s4844_s17, 1  ;;  %v3701_v31 = vsel %vm514_vm3, %v3669_v26, %v527_v30  ;;  %v3716_v34 = vsel %vm514_vm3, %v527_v30, %v528_v33  ;;  %v3732_v37 = vsel %vm514_vm3, %v3719_v35, %v530_v36  ;;  %v578_v53 = vrot.slane %v3585_v10, 1 }
  0x21   : > { %691 = vrot.lane.b32.xlu1 %v3610_v15, %s3444_s15  ;;  %642 = vrot.lane.b32.xlu0 %v3614_v16, %s3445_s16  ;;  %s3642_s25 = scalar_lea.vmem %s4776_s1, %s2907_s21  ;;  %s456_s20 = sadd.s32 %s3683_s19, %s3553_s18  ;;  %v3747_v40 = vsel %vm514_vm3, %v530_v36, %v531_v39  ;;  %v3766_v43 = vsel %vm514_vm3, %v3750_v41, %v533_v42  ;;  %v3793_v51 = vsel %vm514_vm3, %v533_v42, %v534_v45  ;;  %v1806_v56 = vrot.slane %v3669_v26, 6  ;;  %v3847_v36 = vld [vmem:[%s3567_s13 + $0x68] sm:$0xff]  ;;  %v3852_v42 = vld [vmem:[%s3567_s13 + $0x78] sm:$0xff] }
  0x22   : > { %v3645_v22 = vld [vmem:[%s3642_s25] sm:$0xff]  ;;  %s2914_s17 = sshll.u32 %s456_s20, 3  ;;  %v1805_v57 = vsel %vm1770_vm4, %v3636_v20, %v3570_v4  ;;  %v1927_v60 = vrot.slane %v3704_v32, 6  ;;  %v3819_v61 = vsel %vm573_vm5, %v577_v52, %v578_v53  ;;  %v1808_v0 = vrot.slane %v3719_v35, 5  ;;  %4805 = vst [vmem:[#allocation6_spill] sm:$0xff] %v3852_v42  ;;  %s4408_s14 = scalar_lea.vmem %s4783_s8, %s2918_s22 }
  0x23   : > { %v3649_v23 = vsel %vm1770_vm4, %v518_v8, %v3645_v22  ;;  %s458_s24 = scalar_lea.vmem %s4777_s2, %s2914_s17  ;;  %v1807_v63 = vsel %vm1773_vm6, %v1806_v56, %v1805_v57  ;;  %v1810_v8 = vrot.slane %v3750_v41, 4  ;;  %v1812_v11 = vrot.slane %v3825_v62, 3  ;;  %s3449_s23 = smov 120  }
  0x24   : > { %v3779_v46 = vld [vmem:[%s458_s24] sm:$0xff]  ;;  %v3781_v47 = vld [vmem:[%s458_s24 + $0x8] sm:$0xff]  ;;  %v1928_v20 = vsel %vm1770_vm4, %v1927_v60, %v525_v21  ;;  %v1809_v27 = vsel %vm1776_vm7, %v1808_v0, %v1807_v63  ;;  %v1814_v28 = vrot.slane %v3830_v1, 2  ;;  %v580_v29 = vrot.slane %v3570_v4, 1  ;;  %s3450_s13 = smov 124   ;;  %p3029_p10 = scmp.ne.s32.totalorder %s3425_s27, 0 }
  0x25   : > { %646 = vrot.lane.b32.xlu1 %v3610_v15, %s3445_s16  ;;  %644 = vrot.lane.b32.xlu0 %v3591_v12, %s3445_s16  ;;  %v601_v48 = vrot.slane %v3779_v46, 1  ;;  %v602_v49 = vrot.slane %v3781_v47, 1  ;;  %v581_v30 = vrot.slane %v3577_v6, 1  ;;  %v1811_v33 = vsel %vm1779_vm8, %v1810_v8, %v1809_v27  ;;  %s3451_s19 = smov (!%p3029_p10), 8   ;;  %s3454_s24 = smov (!%p3029_p10), 4  }
  0x26   : > { %v1813_v21 = vsel %vm1782_vm9, %v1812_v11, %v1811_v33  ;;  %v1929_v39 = vrot.slane %v3735_v38, 5  ;;  %v1931_v52 = vrot.slane %v3769_v44, 4  ;;  %v1933_v54 = vrot.slane %v3847_v36, 3 }
  0x27   : > { %v3790_v50 = vsel %vm573_vm5, %v601_v48, %v602_v49  ;;  %v3811_v59 = vsel %vm573_vm5, %v602_v49, %v3781_v47  ;;  %v1815_v45 = vsel %vm1785_vm10, %v1814_v28, %v1813_v21  ;;  %v1935_v57 = vrot.slane %v3852_v42, 2 }
  0x28   : > { %v3862_v55 = vsel %vm1787_vm11, %v601_v48, %v1815_v45  ;;  %v1930_v56 = vsel %vm1773_vm6, %v1929_v39, %v1928_v20  ;;  %v3867_v60 = vsel %vm573_vm5, %v580_v29, %v581_v30  ;;  %v3871_v63 = vsel %vm573_vm5, %v578_v53, %v3585_v10  ;;  %v3943_v45 = vld [vmem:[%s3642_s25 + $0x8] sm:$0xff] }
  0x29   : > { %695 = vrot.lane.b32.xlu1 %v3661_v24, %s3444_s15  ;;  %693 = vrot.lane.b32.xlu0 %v3666_v25, %s3444_s15  ;;  %v1932_v0 = vsel %vm1776_vm7, %v1931_v52, %v1930_v56  ;;  %v3885_v20 = vsel %vm573_vm5, %v581_v30, %v3577_v6  ;;  %v583_v53 = vrot.slane %v3624_v19, 1  ;;  %v586_v29 = vrot.slane %v3669_v26, 1 }
  0x2a   : > { %v1934_v8 = vsel %vm1779_vm8, %v1933_v54, %v1932_v0  ;;  %v587_v30 = vrot.slane %v3704_v32, 1  ;;  %v515_v39 = vrot.slane %v3645_v22, 7  ;;  %v516_v54 = vrot.slane %v3943_v45, 7 }
  0x2b   : > { %v1936_v11 = vsel %vm1782_vm9, %v1935_v57, %v1934_v8  ;;  %v589_v56 = vrot.slane %v3719_v35, 1  ;;  %v590_v57 = vrot.slane %v3735_v38, 1 }
  0x2c   : > { %v3881_v48 = vsel %vm1785_vm10, %v602_v49, %v1936_v11  ;;  %v584_v49 = vrot.slane %v3621_v18, 1  ;;  %v3927_v33 = vsel %vm573_vm5, %v586_v29, %v587_v30  ;;  %v3935_v21 = vsel %vm573_vm5, %v587_v30, %v3704_v32 }
  0x2d   : > { %773 = vrot.lane.b32.xlu1 %v3574_v5, %s3445_s16  ;;  %648 = vrot.lane.b32.xlu0 %v3666_v25, %s3445_s16  ;;  %v563_v52 = vsel %vm514_vm3, %v3645_v22, %v515_v39  ;;  %v3963_v29 = vsel %vm573_vm5, %v589_v56, %v590_v57 }
  0x2e   : > { %v3902_v27 = vsel %vm573_vm5, %v583_v53, %v584_v49  ;;  %v3910_v28 = vsel %vm573_vm5, %v584_v49, %v3621_v18  ;;  %v517_v49 = vsel %vm514_vm3, %v515_v39, %v516_v54  ;;  %v3974_v39 = vsel %vm573_vm5, %v590_v57, %v3735_v38 }
  0x31   : > { %697 = vrot.lane.b32.xlu1 %v3701_v31, %s3444_s15  ;;  %650 = vrot.lane.b32.xlu0 %v3661_v24, %s3445_s16 }
  0x35   : > { %821 = vrot.lane.b32.xlu1 %v3570_v4, %s3444_s15  ;;  %775 = vrot.lane.b32.xlu0 %v3585_v10, %s3445_s16 }
  0x39   : > { %823 = vrot.lane.b32.xlu1 %v3577_v6, %s3444_s15  ;;  %699 = vrot.lane.b32.xlu0 %v3716_v34, %s3444_s15 }
  0x3d   : > { %777 = vrot.lane.b32.xlu1 %v3570_v4, %s3445_s16  ;;  %652 = vrot.lane.b32.xlu0 %v3701_v31, %s3445_s16 }
  0x41   : > { %701 = vrot.lane.b32.xlu1 %v3732_v37, %s3444_s15  ;;  %654 = vrot.lane.b32.xlu0 %v3716_v34, %s3445_s16 }
  0x45   : > { %825 = vrot.lane.b32.xlu1 %v3624_v19, %s3444_s15  ;;  %779 = vrot.lane.b32.xlu0 %v3577_v6, %s3445_s16 }
  0x49   : > { %827 = vrot.lane.b32.xlu1 %v3621_v18, %s3444_s15  ;;  %703 = vrot.lane.b32.xlu0 %v3747_v40, %s3444_s15 }
  0x4d   : > { %781 = vrot.lane.b32.xlu1 %v3624_v19, %s3445_s16  ;;  %656 = vrot.lane.b32.xlu0 %v3732_v37, %s3445_s16 }
  0x51   : > { %705 = vrot.lane.b32.xlu1 %v3766_v43, %s3444_s15  ;;  %658 = vrot.lane.b32.xlu0 %v3747_v40, %s3445_s16 }
  0x55   : > { %829 = vrot.lane.b32.xlu1 %v3669_v26, %s3444_s15  ;;  %783 = vrot.lane.b32.xlu0 %v3621_v18, %s3445_s16 }
  0x59   : > { %831 = vrot.lane.b32.xlu1 %v3704_v32, %s3444_s15  ;;  %707 = vrot.lane.b32.xlu0 %v3793_v51, %s3444_s15 }
  0x5d   : > { %1306 = vrot.lane.b32.xlu1 %v3819_v61, %s3445_s16  ;;  %785 = vrot.lane.b32.xlu0 %v3669_v26, %s3445_s16 }
  0x61   : > { %833 = vrot.lane.b32.xlu1 %v3719_v35, %s3444_s15  ;;  %787 = vrot.lane.b32.xlu0 %v3704_v32, %s3445_s16 }
  0x65   : > { %1355 = vrot.lane.b32.xlu1 %v3867_v60, %s3444_s15  ;;  %1308 = vrot.lane.b32.xlu0 %v3871_v63, %s3445_s16 }
  0x69   : > { %1357 = vrot.lane.b32.xlu1 %v3885_v20, %s3444_s15  ;;  %835 = vrot.lane.b32.xlu0 %v3735_v38, %s3444_s15 }
  0x6d   : > { %1310 = vrot.lane.b32.xlu1 %v3867_v60, %s3445_s16  ;;  %789 = vrot.lane.b32.xlu0 %v3719_v35, %s3445_s16 }
  0x71   : > { %837 = vrot.lane.b32.xlu1 %v3750_v41, %s3444_s15  ;;  %791 = vrot.lane.b32.xlu0 %v3735_v38, %s3445_s16 }
  0x75   : > { %1359 = vrot.lane.b32.xlu1 %v3902_v27, %s3444_s15  ;;  %1312 = vrot.lane.b32.xlu0 %v3885_v20, %s3445_s16 }
  0x79   : > { %1361 = vrot.lane.b32.xlu1 %v3910_v28, %s3444_s15  ;;  %839 = vrot.lane.b32.xlu0 %v3769_v44, %s3444_s15 }
  0x7d   : > { %1314 = vrot.lane.b32.xlu1 %v3902_v27, %s3445_s16  ;;  %793 = vrot.lane.b32.xlu0 %v3750_v41, %s3445_s16 }
  0x81   : > { %841 = vrot.lane.b32.xlu1 %v3825_v62, %s3444_s15  ;;  %795 = vrot.lane.b32.xlu0 %v3769_v44, %s3445_s16 }
  0x85   : > { %1363 = vrot.lane.b32.xlu1 %v3927_v33, %s3444_s15  ;;  %1316 = vrot.lane.b32.xlu0 %v3910_v28, %s3445_s16 }
  0x89   : > { %1365 = vrot.lane.b32.xlu1 %v3935_v21, %s3444_s15  ;;  %843 = vrot.lane.b32.xlu0 %v3847_v36, %s3444_s15 }
  0x8d   : > { %1318 = vrot.lane.b32.xlu1 %v3927_v33, %s3445_s16  ;;  %797 = vrot.lane.b32.xlu0 %v3825_v62, %s3445_s16 }
  0x8f   : > { %v690_v0 = vpop.permute.xlu1 %689  ;;  %v641_v8 = vpop.permute.xlu0 %640 }
  0x90   : > { %v738_v11 = vsel %vm737_vm12, %v563_v52, %v641_v8 }
  0x91   : > { %845 = vrot.lane.b32.xlu1 %v3830_v1, %s3444_s15  ;;  %799 = vrot.lane.b32.xlu0 %v3847_v36, %s3445_s16  ;;  %v755_v53 = vsel %vm754_vm13, %v738_v11, %v690_v0 }
  0x92   : > { %3176 = vmatprep.mubr.msk.f32.mxu0 %vm904_vm14, %v755_v53  ;;  %v593_v53 = vrot.slane %v3769_v44, 1 }
  0x93   : > { %v692_v30 = vpop.permute.xlu1 %691  ;;  %v643_v9 = vpop.permute.xlu0 %642 }
  0x94   : > { %v739_v14 = vsel %vm737_vm12, %v517_v49, %v643_v9 }
  0x95   : > { %1367 = vrot.lane.b32.xlu1 %v3963_v29, %s3444_s15  ;;  %1320 = vrot.lane.b32.xlu0 %v3935_v21, %s3445_s16  ;;  %v756_v52 = vsel %vm754_vm13, %v739_v14, %v692_v30 }
  0x96   : > { %3177 = vmatmul.mubr.msk.f32.vlgmr.msra.gmra.mrb[0].mxu0 %vm904_vm14, %v756_v52 }
  0x97   : > { %v647_v54 = vpop.permute.xlu1 %646  ;;  %v645_v56 = vpop.permute.xlu0 %644  ;;  %3293 = vmatpush3.bf16.msk.msra.mxu0 %vm3549_vm2, %v3807_v58  ;;  %v592_v58 = vrot.slane %v3750_v41, 1 }
  0x98   : > { %v741_v9 = vsel %vm737_vm12, %v3614_v16, %v647_v54  ;;  %v740_v14 = vsel %vm737_vm12, %v3595_v13, %v645_v56  ;;  %v537_v16 = vrot.slane %v3847_v36, 7 }
  0x99   : > { %1369 = vrot.lane.b32.xlu1 %v3974_v39, %s3444_s15  ;;  %847 = vrot.lane.b32.xlu0 %v3852_v42, %s3444_s15  ;;  %v4004_v52 = vsel %vm573_vm5, %v592_v58, %v593_v53  ;;  %v536_v58 = vrot.slane %v3825_v62, 7 }
  0x9b   : > { %v696_v57 = vpop.permute.xlu1 %695  ;;  %v694_v0 = vpop.permute.xlu0 %693 }
  0x9c   : > { %v758_v8 = vsel %vm754_vm13, %v741_v9, %v696_v57  ;;  %v757_v11 = vsel %vm754_vm13, %v740_v14, %v694_v0  ;;  %v4016_v57 = vsel %vm573_vm5, %v593_v53, %v3769_v44 }
  0x9d   : > { %1322 = vrot.lane.b32.xlu1 %v3963_v29, %s3445_s16  ;;  %801 = vrot.lane.b32.xlu0 %v3830_v1, %s3445_s16 }
  0x9e   : > { %3179 = vmatprep.mubr.msk.f32.mxu0 %vm904_vm14, %v757_v11 }
  0x9f   : > { %3180 = vmatmul.mubr.msk.f32.gmra.mrb[2].mxu0 %vm904_vm14, %v758_v8  ;;  %v3997_v49 = vpop.permute.xlu1 %773  ;;  %v649_v30 = vpop.permute.xlu0 %648 }
  0xa0   : > { %4806 = vst [vmem:[#allocation7_spill] sm:$0xff] %v3997_v49  ;;  %v742_v54 = vsel %vm737_vm12, %v3591_v12, %v649_v30  ;;  %v869_v12 = vsel %vm737_vm12, %v3645_v22, %v3997_v49  ;;  %v4793_v49 = vmov 0.0|0.0  }
  0xa1   : > { %849 = vrot.lane.b32.xlu1 %v3779_v46, %s3444_s15  ;;  %803 = vrot.lane.b32.xlu0 %v3852_v42, %s3445_s16 }
  0xa3   : > { %v698_v56 = vpop.permute.xlu1 %697  ;;  %v651_v9 = vpop.permute.xlu0 %650 }
  0xa4   : > { %v759_v14 = vsel %vm754_vm13, %v742_v54, %v698_v56  ;;  %v743_v53 = vsel %vm737_vm12, %v3610_v15, %v651_v9  ;;  %v4048_v15 = vsel %vm514_vm3, %v3825_v62, %v536_v58  ;;  %v4787_v9 = vrot.slane %v3825_v62, 1 }
  0xa5   : > { %1371 = vrot.lane.b32.xlu1 %v4004_v52, %s3444_s15  ;;  %1324 = vrot.lane.b32.xlu0 %v3974_v39, %s3445_s16 }
  0xa6   : > { %3182 = vmatprep.mubr.msk.f32.mxu0 %vm904_vm14, %v759_v14 }
  0xa7   : > { %v822_v0 = vpop.permute.xlu1 %821  ;;  %v4021_v8 = vpop.permute.xlu0 %775 }
  0xa8   : > { %4807 = vst [vmem:[#allocation8_spill] sm:$0xff] %v4021_v8  ;;  %v885_v11 = vsel %vm754_vm13, %v869_v12, %v822_v0  ;;  %v870_v30 = vsel %vm737_vm12, %v3943_v45, %v4021_v8  ;;  %v4052_v0 = vrot.slane %v3847_v36, 1 }
  0xa9   : > { %3148 = vmatprep.mubr.msk.f32.mxu1 %vm904_vm14, %v885_v11  ;;  %1373 = vrot.lane.b32.xlu1 %v4016_v57, %s3444_s15 }
  0xaa   : > { %851 = vrot.lane.b32.xlu0 %v3781_v47, %s3444_s15  ;;  %4809 = vst [vmem:[#allocation10_spill] sm:$0xff] %v4052_v0 }
  0xab   : > { %v824_v54 = vpop.permute.xlu1 %823  ;;  %v700_v56 = vpop.permute.xlu0 %699 }
  0xac   : > { %v4036_v14 = vsel %vm754_vm13, %v870_v30, %v824_v54  ;;  %v760_v12 = vsel %vm754_vm13, %v743_v53, %v700_v56  ;;  %v4065_v30 = vsel %vm573_vm5, %v4787_v9, %v4052_v0  ;;  %v4079_v9 = vsel %vm573_vm5, %v4052_v0, %v3847_v36 }
  0xad   : > { %4808 = vst [vmem:[#allocation9_spill] sm:$0xff] %v4036_v14  ;;  %1326 = vrot.lane.b32.xlu1 %v4004_v52, %s3445_s16  ;;  %3149 = vmatmul.mubr.msk.f32.vlgmr.msra.gmra.mrb[0].mxu1 %vm904_vm14, %v4036_v14  ;;  %v1791_v14 = vrot.slane %v3624_v19, 6 }
  0xae   : > { %660 = vrot.lane.b32.xlu0 %v3766_v43, %s3445_s16  ;;  %3183 = vmatmul.mubr.msk.f32.gmra.mrb[4].mxu0 %vm904_vm14, %v760_v12 }
  0xaf   : > { %v778_v11 = vpop.permute.xlu1 %777  ;;  %v653_v53 = vpop.permute.xlu0 %652  ;;  %3315 = vmatpush3.bf16.msk.msra.mxu1 %vm3549_vm2, %v3545_v2 }
  0xb0   : > { %v744_v54 = vsel %vm737_vm12, %v3666_v25, %v653_v53  ;;  %v871_v25 = vsel %vm737_vm12, %v3574_v5, %v778_v11  ;;  %3294 = vmatprep.subr.bf16.mxu1 %v4793_v49  ;;  %v1790_v49 = vsel %vm1770_vm4, %v3580_v7, %v3574_v5 }
  0xb1   : > { %709 = vrot.lane.b32.xlu1 %v4048_v15, %s3444_s15  ;;  %v1792_v5 = vsel %vm1773_vm6, %v1791_v14, %v1790_v49  ;;  %v1915_v49 = vrot.slane %v3704_v32, 5  ;;  %v4812_v14 = vrot.slane %v3577_v6, 7 }
  0xb2   : > { %662 = vrot.lane.b32.xlu0 %v3793_v51, %s3445_s16 }
  0xb3   : > { %v702_v56 = vpop.permute.xlu1 %701  ;;  %v655_v12 = vpop.permute.xlu0 %654 }
  0xb4   : > { %v761_v2 = vsel %vm754_vm13, %v744_v54, %v702_v56  ;;  %v4084_v54 = vsel %vm514_vm3, %v536_v58, %v537_v16  ;;  %v745_v11 = vsel %vm737_vm12, %v3661_v24, %v655_v12 }
  0xb5   : > { %1375 = vrot.lane.b32.xlu1 %v4065_v30, %s3444_s15  ;;  %3185 = vmatprep.mubr.msk.f32.mxu0 %vm904_vm14, %v761_v2  ;;  %v539_v2 = vrot.slane %v3830_v1, 7 }
  0xb6   : > { %1328 = vrot.lane.b32.xlu0 %v4016_v57, %s3445_s16 }
  0xb7   : > { %v826_v53 = vpop.permute.xlu1 %825  ;;  %v780_v8 = vpop.permute.xlu0 %779  ;;  %v4107_v24 = vsel %vm514_vm3, %v3830_v1, %v539_v2 }
  0xb8   : > { %v887_v56 = vsel %vm754_vm13, %v871_v25, %v826_v53  ;;  %v872_v13 = vsel %vm737_vm12, %v3585_v10, %v780_v8  ;;  %4810 = vst [vmem:[#allocation11_spill] sm:$0xff] %v4107_v24  ;;  %v4790_v10 = vrot.slane %v3830_v1, 1 }
  0xb9   : > { %1377 = vrot.lane.b32.xlu1 %v4079_v9, %s3444_s15  ;;  %3151 = vmatprep.mubr.msk.f32.mxu1 %vm904_vm14, %v887_v56 }
  0xba   : > { %711 = vrot.lane.b32.xlu0 %v4084_v54, %s3444_s15 }
  0xbb   : > { %v828_v16 = vpop.permute.xlu1 %827  ;;  %v704_v58 = vpop.permute.xlu0 %703 }
  0xbc   : > { %v888_v25 = vsel %vm754_vm13, %v872_v13, %v828_v16  ;;  %v762_v53 = vsel %vm754_vm13, %v745_v11, %v704_v58  ;;  %v4111_v13 = vrot.slane %v3852_v42, 1 }
  0xbd   : > { %1330 = vrot.lane.b32.xlu1 %v4065_v30, %s3445_s16  ;;  %3152 = vmatmul.mubr.msk.f32.gmra.mrb[2].mxu1 %vm904_vm14, %v888_v25 }
  0xbe   : > { %664 = vrot.lane.b32.xlu0 %v4048_v15, %s3445_s16  ;;  %3186 = vmatmul.mubr.msk.f32.gmra.mrb[6].mxu0 %vm904_vm14, %v762_v53  ;;  %v600_v56 = vsel %vm573_vm5, %v4790_v10, %v4111_v13  ;;  %v630_v10 = vsel %vm573_vm5, %v4111_v13, %v3852_v42 }
  0xbf   : > { %v782_v8 = vpop.permute.xlu1 %781  ;;  %v657_v12 = vpop.permute.xlu0 %656 }
  0xc0   : > { %v746_v11 = vsel %vm737_vm12, %v3701_v31, %v657_v12  ;;  %v873_v31 = vsel %vm737_vm12, %v3570_v4, %v782_v8  ;;  %v542_v8 = vrot.slane %v3779_v46, 7 }
  0xc1   : > { %713 = vrot.lane.b32.xlu1 %v4107_v24, %s3444_s15 }
  0xc2   : > { %666 = vrot.lane.b32.xlu0 %v4084_v54, %s3445_s16 }
  0xc3   : > { %v706_v16 = vpop.permute.xlu1 %705  ;;  %v659_v58 = vpop.permute.xlu0 %658 }
  0xc4   : > { %v763_v53 = vsel %vm754_vm13, %v746_v11, %v706_v16  ;;  %v4811_v11 = vrot.slane %v3852_v42, 7  ;;  %v1793_v42 = vrot.slane %v3669_v26, 5 }
  0xc5   : > { %1379 = vrot.lane.b32.xlu1 %v600_v56, %s3444_s15  ;;  %3188 = vmatprep.mubr.msk.f32.mxu0 %vm904_vm14, %v763_v53 }
  0xc6   : > { %1332 = vrot.lane.b32.xlu0 %v4079_v9, %s3445_s16  ;;  %v4138_v16 = vsel %vm514_vm3, %v539_v2, %v4811_v11  ;;  %v747_v2 = vsel %vm737_vm12, %v3716_v34, %v659_v58  ;;  %v572_v34 = vsel %vm514_vm3, %v3779_v46, %v542_v8  ;;  %v1795_v58 = vrot.slane %v3719_v35, 4 }
  0xc7   : > { %v830_v12 = vpop.permute.xlu1 %829  ;;  %v784_v25 = vpop.permute.xlu0 %783  ;;  %v1797_v46 = vrot.slane %v3750_v41, 3 }
  0xc8   : > { %v889_v53 = vsel %vm754_vm13, %v873_v31, %v830_v12  ;;  %v874_v31 = vsel %vm737_vm12, %v3577_v6, %v784_v25 }
  0xc9   : > { %1381 = vrot.lane.b32.xlu1 %v630_v10, %s3444_s15  ;;  %3154 = vmatprep.mubr.msk.f32.mxu1 %vm904_vm14, %v889_v53  ;;  %v1913_v53 = vrot.slane %v3621_v18, 6 }
  0xca   : > { %715 = vrot.lane.b32.xlu0 %v4138_v16, %s3444_s15 }
  0xcb   : > { %v832_v12 = vpop.permute.xlu1 %831  ;;  %v708_v11 = vpop.permute.xlu0 %707 }
  0xcc   : > { %v890_v0 = vsel %vm754_vm13, %v874_v31, %v832_v12  ;;  %v764_v7 = vsel %vm754_vm13, %v747_v2, %v708_v11  ;;  %v1794_v2 = vsel %vm1776_vm7, %v1793_v42, %v1792_v5  ;;  %v575_v12 = vrot.slane %v3943_v45, 1 }
  0xcd   : > { %1334 = vrot.lane.b32.xlu1 %v600_v56, %s3445_s16  ;;  %3155 = vmatmul.mubr.msk.f32.gmra.mrb[4].mxu1 %vm904_vm14, %v890_v0  ;;  %v1914_v0 = vsel %vm1770_vm4, %v1913_v53, %v4812_v14  ;;  %v574_v56 = vrot.slane %v3645_v22, 1  ;;  %v1796_v11 = vsel %vm1779_vm8, %v1795_v58, %v1794_v2  ;;  %v1917_v5 = vrot.slane %v3735_v38, 4 }
  0xce   : > { %668 = vrot.lane.b32.xlu0 %v4107_v24, %s3445_s16  ;;  %3189 = vmatmul.mubr.msk.f32.gmra.mrb[8].mxu0 %vm904_vm14, %v764_v7  ;;  %v543_v22 = vrot.slane %v3781_v47, 7  ;;  %v1916_v7 = vsel %vm1773_vm6, %v1915_v49, %v1914_v0  ;;  %v1799_v24 = vrot.slane %v3825_v62, 2  ;;  %v1798_v58 = vsel %vm1782_vm9, %v1797_v46, %v1796_v11 }
  0xcf   : > { %v1307_v25 = vpop.permute.xlu1 %1306  ;;  %v786_v31 = vpop.permute.xlu0 %785  ;;  %v1918_v47 = vsel %vm1776_vm7, %v1917_v5, %v1916_v7  ;;  %v1921_v46 = vrot.slane %v3847_v36, 2  ;;  %vm3453_vm4 = vmmov (!%p3029_p10), 0  }
  0xd0   : > { %v875_v6 = vsel %vm737_vm12, %v3624_v19, %v786_v31  ;;  %v1919_v31 = vrot.slane %v3769_v44, 3 }
  0xd1   : > { %717 = vrot.lane.b32.xlu1 %v572_v34, %s3444_s15  ;;  %v576_v34 = vsel %vm573_vm5, %v574_v56, %v575_v12  ;;  %v544_v56 = vsel %vm514_vm3, %v542_v8, %v543_v22 }
  0xd2   : > { %670 = vrot.lane.b32.xlu0 %v4138_v16, %s3445_s16  ;;  %v1403_v2 = vsel %vm737_vm12, %v576_v34, %v1307_v25 }
  0xd3   : > { %v834_v42 = vpop.permute.xlu1 %833  ;;  %v788_v53 = vpop.permute.xlu0 %787 }
  0xd4   : > { %v891_v14 = vsel %vm754_vm13, %v875_v6, %v834_v42  ;;  %v1800_v42 = vsel %vm1785_vm10, %v1799_v24, %v1798_v58  ;;  %v876_v8 = vsel %vm737_vm12, %v3621_v18, %v788_v53  ;;  %v4813_v24 = vrot.slane %v3830_v1, 1 }
  0xd5   : > { %1383 = vrot.lane.b32.xlu1 %v3790_v50, %s3444_s15  ;;  %3157 = vmatprep.mubr.msk.f32.mxu1 %vm904_vm14, %v891_v14  ;;  %v622_v50 = vsel %vm573_vm5, %v575_v12, %v3943_v45 }
  0xd6   : > { %1336 = vrot.lane.b32.xlu0 %v630_v10, %s3445_s16  ;;  %v1920_v10 = vsel %vm1779_vm8, %v1919_v31, %v1918_v47  ;;  %v1801_v12 = vsel %vm1787_vm11, %v4813_v24, %v1800_v42 }
  0xd7   : > { %v1356_v49 = vpop.permute.xlu1 %1355  ;;  %v1309_v0 = vpop.permute.xlu0 %1308  ;;  %v1922_v22 = vsel %vm1782_vm9, %v1921_v46, %v1920_v10 }
  0xd8   : > { %v1419_v6 = vsel %vm754_vm13, %v1403_v2, %v1356_v49  ;;  %v1404_v25 = vsel %vm737_vm12, %v622_v50, %v1309_v0  ;;  %v1923_v34 = vsel %vm1785_vm10, %v4111_v13, %v1922_v22 }
  0xd9   : > { %1385 = vrot.lane.b32.xlu1 %v3811_v59, %s3444_s15  ;;  %3204 = vmatprep.mubr.msk.f32.mxu0 %vm904_vm14, %v1419_v6 }
  0xda   : > { %719 = vrot.lane.b32.xlu0 %v544_v56, %s3444_s15 }
  0xdb   : > { %v1358_v11 = vpop.permute.xlu1 %1357  ;;  %v836_v45 = vpop.permute.xlu0 %835 }
  0xdc   : > { %v1420_v5 = vsel %vm754_vm13, %v1404_v25, %v1358_v11  ;;  %v892_v59 = vsel %vm754_vm13, %v876_v8, %v836_v45 }
  0xdd   : > { %3158 = vmatmul.mubr.msk.f32.gmra.mrb[6].mxu1 %vm904_vm14, %v892_v59  ;;  %3205 = vmatmul.mubr.msk.f32.vlgmr.msra.gmra.mrb[0].mxu0 %vm904_vm14, %v1420_v5 }
  0xde   : > { %1802 = vrot.lane.b32.xlu0 %v1801_v12, %s3445_s16  ;;  %1817 = vrot.lane.b32.xlu1 %v3862_v55, %s3444_s15 }
  0xdf   : > { %v1311_v53 = vpop.permute.xlu1 %1310  ;;  %v790_v7 = vpop.permute.xlu0 %789 }
  0xe0   : > { %v877_v14 = vsel %vm737_vm12, %v3669_v26, %v790_v7  ;;  %v1405_v55 = vsel %vm737_vm12, %v3819_v61, %v1311_v53 }
  0xe2   : > { %1924 = vrot.lane.b32.xlu0 %v1923_v34, %s3445_s16  ;;  %1938 = vrot.lane.b32.xlu1 %v3881_v48, %s3444_s15 }
  0xe3   : > { %v838_v58 = vpop.permute.xlu1 %837  ;;  %v792_v31 = vpop.permute.xlu0 %791 }
  0xe4   : > { %v893_v47 = vsel %vm754_vm13, %v877_v14, %v838_v58  ;;  %v878_v48 = vsel %vm737_vm12, %v3704_v32, %v792_v31 }
  0xe5   : > { %3160 = vmatprep.mubr.msk.f32.mxu1 %vm904_vm14, %v893_v47 }
  0xe7   : > { %v1360_v2 = vpop.permute.xlu1 %1359  ;;  %v1313_v49 = vpop.permute.xlu0 %1312 }
  0xe8   : > { %v1421_v13 = vsel %vm754_vm13, %v1405_v55, %v1360_v2  ;;  %v1406_v0 = vsel %vm737_vm12, %v3871_v63, %v1313_v49 }
  0xe9   : > { %3207 = vmatprep.mubr.msk.f32.mxu0 %vm904_vm14, %v1421_v13 }
  0xeb   : > { %v1362_v56 = vpop.permute.xlu1 %1361  ;;  %v840_v6 = vpop.permute.xlu0 %839 }
  0xec   : > { %v1422_v50 = vsel %vm754_vm13, %v1406_v0, %v1362_v56  ;;  %v894_v42 = vsel %vm754_vm13, %v878_v48, %v840_v6 }
  0xed   : > { %3161 = vmatmul.mubr.msk.f32.gmra.mrb[8].mxu1 %vm904_vm14, %v894_v42  ;;  %3208 = vmatmul.mubr.msk.f32.gmra.mrb[2].mxu0 %vm904_vm14, %v1422_v50 }
  0xef   : > { %v1315_v46 = vpop.permute.xlu1 %1314  ;;  %v794_v10 = vpop.permute.xlu0 %793 }
  0xf0   : > { %v879_v8 = vsel %vm737_vm12, %v3719_v35, %v794_v10  ;;  %v1407_v24 = vsel %vm737_vm12, %v3867_v60, %v1315_v46 }
  0xf3   : > { %v842_v25 = vpop.permute.xlu1 %841  ;;  %v796_v11 = vpop.permute.xlu0 %795 }
  0xf4   : > { %v895_v45 = vsel %vm754_vm13, %v879_v8, %v842_v25  ;;  %v880_v22 = vsel %vm737_vm12, %v3735_v38, %v796_v11 }
  0xf5   : > { %3163 = vmatprep.mubr.msk.f32.mxu1 %vm904_vm14, %v895_v45 }
  0xf7   : > { %v1364_v12 = vpop.permute.xlu1 %1363  ;;  %v1317_v5 = vpop.permute.xlu0 %1316 }
  0xf8   : > { %v1423_v59 = vsel %vm754_vm13, %v1407_v24, %v1364_v12  ;;  %v1408_v53 = vsel %vm737_vm12, %v3885_v20, %v1317_v5 }
  0xf9   : > { %3210 = vmatprep.mubr.msk.f32.mxu0 %vm904_vm14, %v1423_v59 }
  0xfb   : > { %v1366_v7 = vpop.permute.xlu1 %1365  ;;  %v844_v34 = vpop.permute.xlu0 %843 }
  0xfc   : > { %v1424_v14 = vsel %vm754_vm13, %v1408_v53, %v1366_v7  ;;  %v896_v58 = vsel %vm754_vm13, %v880_v22, %v844_v34 }
  0xfd   : > { %3164 = vmatmul.mubr.msk.f32.gmra.mrb[10].mxu1 %vm904_vm14, %v896_v58  ;;  %3211 = vmatmul.mubr.msk.f32.gmra.mrb[4].mxu0 %vm904_vm14, %v1424_v14 }
  0xff   : > { %v1319_v60 = vpop.permute.xlu1 %1318  ;;  %v798_v31 = vpop.permute.xlu0 %797 }
 0x100   : > { %v881_v47 = vsel %vm737_vm12, %v3750_v41, %v798_v31  ;;  %v1409_v20 = vsel %vm737_vm12, %v3902_v27, %v1319_v60 }
 0x103   : > { %v846_v55 = vpop.permute.xlu1 %845  ;;  %v800_v2 = vpop.permute.xlu0 %799 }
 0x104   : > { %v897_v49 = vsel %vm754_vm13, %v881_v47, %v846_v55  ;;  %v882_v56 = vsel %vm737_vm12, %v3769_v44, %v800_v2 }
 0x105   : > { %3166 = vmatprep.mubr.msk.f32.mxu1 %vm904_vm14, %v897_v49 }
 0x107   : > { %v1368_v13 = vpop.permute.xlu1 %1367  ;;  %v1321_v48 = vpop.permute.xlu0 %1320 }
 0x108   : > { %v1425_v0 = vsel %vm754_vm13, %v1409_v20, %v1368_v13  ;;  %v1410_v6 = vsel %vm737_vm12, %v3910_v28, %v1321_v48  ;;  %v1822_v13 = vld [vmem:[%s4779_s4] sm:$0xff] }
 0x109   : > { %3213 = vmatprep.mubr.msk.f32.mxu0 %vm904_vm14, %v1425_v0 }
 0x10b   : > { %v1370_v50 = vpop.permute.xlu1 %1369  ;;  %v848_v42 = vpop.permute.xlu0 %847 }
 0x10c   : > { %v1426_v46 = vsel %vm754_vm13, %v1410_v6, %v1370_v50  ;;  %v898_v10 = vsel %vm754_vm13, %v882_v56, %v848_v42 }
 0x10d   : > { %3167 = vmatmul.mubr.msk.f32.gmra.mrb[12].mxu1 %vm904_vm14, %v898_v10  ;;  %3214 = vmatmul.mubr.msk.f32.gmra.mrb[6].mxu0 %vm904_vm14, %v1426_v46 }
 0x10f   : > { %v1323_v27 = vpop.permute.xlu1 %1322  ;;  %v4273_v8 = vpop.permute.xlu0 %801 }
 0x110   : > { %v883_v25 = vsel %vm737_vm12, %v3825_v62, %v4273_v8  ;;  %v1411_v24 = vsel %vm737_vm12, %v3927_v33, %v1323_v27 }
 0x113   : > { %v850_v11 = vpop.permute.xlu1 %849  ;;  %v4278_v45 = vpop.permute.xlu0 %803 }
 0x114   : > { %v899_v28 = vsel %vm754_vm13, %v883_v25, %v850_v11  ;;  %v884_v7 = vsel %vm737_vm12, %v3847_v36, %v4278_v45 }
 0x115   : > { %3169 = vmatprep.mubr.msk.f32.mxu1 %vm904_vm14, %v899_v28 }
 0x117   : > { %v1372_v12 = vpop.permute.xlu1 %1371  ;;  %v1325_v5 = vpop.permute.xlu0 %1324 }
 0x118   : > { %v1427_v59 = vsel %vm754_vm13, %v1411_v24, %v1372_v12  ;;  %v1412_v22 = vsel %vm737_vm12, %v3935_v21, %v1325_v5 }
 0x119   : > { %3216 = vmatprep.mubr.msk.f32.mxu0 %vm904_vm14, %v1427_v59  ;;  %v1772_v59 = vrot.slane %v3570_v4, 6  ;;  %v1775_v4 = vrot.slane %v3624_v19, 5  ;;  %v1781_v19 = vrot.slane %v3719_v35, 3 }
 0x11b   : > { %v1374_v53 = vpop.permute.xlu1 %1373 }
 0x11c   : > { %v1428_v34 = vsel %vm754_vm13, %v1412_v22, %v1374_v53  ;;  %v852_v14 = vpop.permute.xlu0 %851 }
 0x11d   : > { %v900_v58 = vsel %vm754_vm13, %v884_v7, %v852_v14  ;;  %3217 = vmatmul.mubr.msk.f32.gmra.mrb[8].mxu0 %vm904_vm14, %v1428_v34 }
 0x11e   : > { %3170 = vmatmul.mubr.msk.f32.gmra.mrb[14].mxu1 %vm904_vm14, %v900_v58 }
 0x11f   : > { %v1327_v33 = vpop.permute.xlu1 %1326 }
 0x120   : > { %v661_v60 = vpop.permute.xlu0 %660  ;;  %v1413_v36 = vsel %vm737_vm12, %v3963_v29, %v1327_v33  ;;  %v1778_v33 = vrot.slane %v3669_v26, 4 }
 0x121   : > { %v748_v31 = vsel %vm737_vm12, %v3732_v37, %v661_v60  ;;  %v1823_v37 = vld [vmem:[%s4779_s4 + $0x8] sm:$0xf]  ;;  %v1902_v60 = vrot.slane %v3621_v18, 5 }
 0x122   : > { %v3295_v56 = vpack.c.bf16 %v1823_v37, %v1822_v13  ;;  %v1906_v13 = vrot.slane %v3735_v38, 3 }
 0x123   : > { %v710_v21 = vpop.permute.xlu1 %709  ;;  %v1903_v26 = vsel %vm1773_vm6, %v1902_v60, %v3618_v17  ;;  %v4403_v60 = vld [vmem:[%s4782_s7] ss:$0 sm:$0xff] }
 0x124   : > { %v765_v47 = vsel %vm754_vm13, %v748_v31, %v710_v21  ;;  %v663_v55 = vpop.permute.xlu0 %662 }
 0x125   : > { %3191 = vmatprep.mubr.msk.f32.mxu1 %vm904_vm14, %v765_v47  ;;  %v749_v29 = vsel %vm737_vm12, %v3747_v40, %v663_v55 }
 0x127   : > { %v1376_v2 = vpop.permute.xlu1 %1375 }
 0x128   : > { %v1429_v49 = vsel %vm754_vm13, %v1413_v36, %v1376_v2  ;;  %v1329_v20 = vpop.permute.xlu0 %1328  ;;  %v1904_v36 = vrot.slane %v3704_v32, 4 }
 0x129   : > { %3219 = vmatprep.mubr.msk.f32.mxu0 %vm904_vm14, %v1429_v49  ;;  %v1414_v48 = vsel %vm737_vm12, %v3974_v39, %v1329_v20  ;;  %v4814_v39 = vmov 0.0|0.0  }
 0x12a   : > { %v1905_v32 = vsel %vm1776_vm7, %v1904_v36, %v1903_v26 }
 0x12b   : > { %v1378_v0 = vpop.permute.xlu1 %1377  ;;  %v1907_v38 = vsel %vm1779_vm8, %v1906_v13, %v1905_v32 }
 0x12c   : > { %v1430_v6 = vsel %vm754_vm13, %v1414_v48, %v1378_v0  ;;  %v712_v50 = vpop.permute.xlu0 %711  ;;  %v1908_v48 = vrot.slane %v3769_v44, 2  ;;  %v2994_v44 = vld [vmem:[%s4779_s4 + $0x18] sm:$0xf] }
 0x12d   : > { %v766_v42 = vsel %vm754_vm13, %v749_v29, %v712_v50  ;;  %3220 = vmatmul.mubr.msk.f32.gmra.mrb[10].mxu0 %vm904_vm14, %v1430_v6  ;;  %v3448_v50 = vmov 0.0  }
 0x12e   : > { %3192 = vmatmul.mubr.msk.f32.vlgmr.msra.gmra.mrb[10].mxu1 %vm904_vm14, %v766_v42  ;;  %v1909_v42 = vsel %vm1782_vm9, %v1908_v48, %v1907_v38 }
 0x12f   : > { %v1331_v46 = vpop.permute.xlu1 %1330  ;;  %3297 = vmatpush3.bf16.msk.msra.mxu1 %vm3549_vm2, %v3295_v56 }
 0x130   : > { %v665_v10 = vpop.permute.xlu0 %664  ;;  %3298 = vmatprep.subr.bf16.mxu1 %v4814_v39  ;;  %v1415_v28 = vsel %vm737_vm12, %v4004_v52, %v1331_v46 }
 0x131   : > { %v750_v27 = vsel %vm737_vm12, %v3766_v43, %v665_v10 }
 0x133   : > { %v714_v40 = vpop.permute.xlu1 %713 }
 0x134   : > { %v767_v25 = vsel %vm754_vm13, %v750_v27, %v714_v40  ;;  %v667_v11 = vpop.permute.xlu0 %666 }
 0x135   : > { %3194 = vmatprep.mubr.msk.f32.mxu1 %vm904_vm14, %v767_v25  ;;  %v751_v53 = vsel %vm737_vm12, %v3793_v51, %v667_v11  ;;  %v4816_v25 = vld [vmem:[#allocation10_spill] sm:$0xff] }
 0x136   : > { %v1910_v11 = vsel %vm1785_vm10, %v4816_v25, %v1909_v42 }
 0x137   : > { %v4326_v24 = vpop.permute.xlu1 %1379 }
 0x138   : > { %v1431_v12 = vsel %vm754_vm13, %v1415_v28, %v4326_v24  ;;  %v1333_v5 = vpop.permute.xlu0 %1332 }
 0x139   : > { %3222 = vmatprep.mubr.msk.f32.mxu0 %vm904_vm14, %v1431_v12  ;;  %v1416_v43 = vsel %vm737_vm12, %v4016_v57, %v1333_v5  ;;  %v1774_v57 = vsel %vm1773_vm6, %v1772_v59, %v3649_v23  ;;  %v4817_v59 = vld [vmem:[#allocation9_spill] sm:$0xff] }
 0x13a   : > { %v1777_v51 = vsel %vm1776_vm7, %v1775_v4, %v1774_v57 }
 0x13b   : > { %v4334_v22 = vpop.permute.xlu1 %1381  ;;  %v1780_v23 = vsel %vm1779_vm8, %v1778_v33, %v1777_v51 }
 0x13c   : > { %v1432_v52 = vsel %vm754_vm13, %v1416_v43, %v4334_v22  ;;  %v716_v7 = vpop.permute.xlu0 %715  ;;  %v1783_v35 = vsel %vm1782_vm9, %v1781_v19, %v1780_v23  ;;  %v1950_v43 = vrot.slane %v4817_v59, 7 }
 0x13d   : > { %v768_v34 = vsel %vm754_vm13, %v751_v53, %v716_v7  ;;  %3223 = vmatmul.mubr.msk.f32.gmra.mrb[12].mxu0 %vm904_vm14, %v1432_v52 }
 0x13e   : > { %3195 = vmatmul.mubr.msk.f32.gmra.mrb[12].mxu1 %vm904_vm14, %v768_v34 }
 0x13f   : > { %v1335_v14 = vpop.permute.xlu1 %1334 }
 0x140   : > { %v669_v58 = vpop.permute.xlu0 %668  ;;  %v1417_v18 = vsel %vm737_vm12, %v4065_v30, %v1335_v14 }
 0x141   : > { %v752_v31 = vsel %vm737_vm12, %v4048_v15, %v669_v58  ;;  %v1784_v15 = vrot.slane %v3750_v41, 2 }
 0x143   : > { %v718_v21 = vpop.permute.xlu1 %717  ;;  %v1786_v30 = vsel %vm1785_vm10, %v1784_v15, %v1783_v35 }
 0x144   : > { %v769_v47 = vsel %vm754_vm13, %v752_v31, %v718_v21  ;;  %v671_v55 = vpop.permute.xlu0 %670 }
 0x145   : > { %3197 = vmatprep.mubr.msk.f32.mxu1 %vm904_vm14, %v769_v47  ;;  %v753_v41 = vsel %vm737_vm12, %v4084_v54, %v671_v55  ;;  %v4815_v54 = vrot.slane %v3825_v62, 1 }
 0x147   : > { %v1384_v2 = vpop.permute.xlu1 %1383  ;;  %v1788_v6 = vsel %vm1787_vm11, %v4815_v54, %v1786_v30 }
 0x148   : > { %v1433_v49 = vsel %vm754_vm13, %v1417_v18, %v1384_v2  ;;  %v1337_v20 = vpop.permute.xlu0 %1336 }
 0x149   : > { %3225 = vmatprep.mubr.msk.f32.mxu0 %vm904_vm14, %v1433_v49  ;;  %v1418_v17 = vsel %vm737_vm12, %v4079_v9, %v1337_v20  ;;  %v2993_v9 = vld [vmem:[%s4779_s4 + $0x10] sm:$0xff] }
 0x14a   : > { %v3299_v39 = vpack.c.bf16 %v2994_v44, %v2993_v9 }
 0x14b   : > { %v1386_v37 = vpop.permute.xlu1 %1385 }
 0x14c   : > { %v1434_v0 = vsel %vm754_vm13, %v1418_v17, %v1386_v37  ;;  %v720_v56 = vpop.permute.xlu0 %719 }
 0x14d   : > { %v770_v29 = vsel %vm754_vm13, %v753_v41, %v720_v56  ;;  %3226 = vmatmul.mubr.msk.f32.gmra.mrb[14].mxu0 %vm904_vm14, %v1434_v0 }
 0x14e   : > { %3198 = vmatmul.mubr.msk.f32.gmra.mrb[14].mxu1 %vm904_vm14, %v770_v29 }
 0x14f   : > { %3232 = vmatprep.mubr.msk.f32.mxu1 %vm3447_vm15, %v3448_v50 }
 0x150   : > { %v1803_v46 = vpop.permute.xlu0 %1802  ;;  %v1818_v10 = vpop.permute.xlu1 %1817 }
 0x151   : > { %v1820_v27 = vsel %vm737_vm12, %v1788_v6, %v1803_v46 }
 0x152   : > { %v1821_v40 = vsel %vm754_vm13, %v1820_v27, %v1818_v10 }
 0x153   : > { %3233 = vmatmul.mubr.msk.f32.vlgmr.msra.gmra.mrb[16].mxu1 %vm904_vm14, %v1821_v40 }
 0x154   : > { %v1925_v62 = vpop.permute.xlu0 %1924  ;;  %v1939_v28 = vpop.permute.xlu1 %1938  ;;  %3301 = vmatpush3.bf16.msk.msra.mxu1 %vm3549_vm2, %v3299_v39  ;;  %3239 = vmatprep.mubr.msk.f32.mxu1 %vm3447_vm15, %v3448_v50 }
 0x155   : > { %v1942_v12 = vsel %vm737_vm12, %v1910_v11, %v1925_v62 }
 0x156   : > { %v1944_v5 = vsel %vm754_vm13, %v1942_v12, %v1939_v28 }
 0x157   : > { %v1951_v53 = vrot.slane %v1944_v5, 7 }
 0x159   : > { %v1952_v52 = vsel %vm514_vm3, %v1950_v43, %v1951_v53  ;;  %vm2165_vm3 = vcmask 57376  }
 0x15a   : > { %3240 = vmatmul.mubr.msk.f32.vlgmr.msra.gmra.mrb[18].mxu1 %vm904_vm14, %v1952_v52 }
 0x180   : > { %v3150_v7 = vpop.f32.mrb[0].mxu1 }
 0x181   : > { %v1023_v34 = vpop.f32.mrb[1].mxu1 }
 0x190   : > { %v3153_v4 = vpop.f32.mrb[2].mxu1 }
 0x191   : > { %v1033_v57 = vpop.f32.mrb[3].mxu1 }
 0x1a0   : > { %v3156_v14 = vpop.f32.mrb[4].mxu1 }
 0x1a1   : > { %v1043_v58 = vpop.f32.mrb[5].mxu1 }
 0x1b0   : > { %v3159_v33 = vpop.f32.mrb[6].mxu1  ;;  %v3206_v51 = vpop.f32.mrb[0].mxu0 }
 0x1b1   : > { %v3316_v31 = vadd.f32 %v3206_v51, %v3150_v7  ;;  %v1053_v21 = vpop.f32.mrb[7].mxu1  ;;  %v1555_v47 = vpop.f32.mrb[1].mxu0 }
 0x1b2   : > { %v3317_v55 = vadd.f32 %v1555_v47, %v1023_v34 }
 0x1b3   : > { %v1658_v19 = vadd.f32 %v3316_v31, %v4403_v60 }
 0x1b4   : > { %v1657_v23 = vadd.f32 %v3317_v55, %v4403_v60 }
 0x1b5   : > { %1674 = vst.msk [vmem:[%s4408_s14 + $0x8] sm:$0xff] %vm754_vm13, %v1658_v19  ;;  %1707 = vrot.lane.b32.xlu1 %v1658_v19, %s3449_s23 }
 0x1b6   : > { %1673 = vst.msk [vmem:[%s4408_s14] sm:$0xff] %vm754_vm13, %v1657_v23  ;;  %1705 = vrot.lane.b32.xlu0 %v1657_v23, %s3449_s23 }
 0x1bd   : > { %v2028_v55 = vld [vmem:[%s4408_s14] sm:$0x1] }
 0x1c0   : > { %v3162_v36 = vpop.f32.mrb[8].mxu1  ;;  %v3209_v26 = vpop.f32.mrb[2].mxu0 }
 0x1c1   : > { %v3318_v18 = vadd.f32 %v3209_v26, %v3153_v4  ;;  %v1063_v2 = vpop.f32.mrb[9].mxu1  ;;  %v1565_v15 = vpop.f32.mrb[3].mxu0 }
 0x1c2   : > { %v3319_v49 = vadd.f32 %v1565_v15, %v1033_v57 }
 0x1c3   : > { %v1660_v20 = vadd.f32 %v3318_v18, %v4403_v60 }
 0x1c4   : > { %v1659_v35 = vadd.f32 %v3319_v49, %v4403_v60 }
 0x1c5   : > { %1676 = vst.msk [vmem:[%s4408_s14 + $0x28] sm:$0xff] %vm754_vm13, %v1660_v20  ;;  %1711 = vrot.lane.b32.xlu1 %v1660_v20, %s3449_s23 }
 0x1c6   : > { %1675 = vst.msk [vmem:[%s4408_s14 + $0x20] sm:$0xff] %vm754_vm13, %v1659_v35  ;;  %1709 = vrot.lane.b32.xlu0 %v1659_v35, %s3449_s23 }
 0x1cd   : > { %v2029_v19 = vld [vmem:[%s4408_s14 + $0x20] sm:$0x1] }
 0x1d0   : > { %v3212_v13 = vpop.f32.mrb[4].mxu0 }
 0x1d1   : > { %v3320_v32 = vadd.f32 %v3212_v13, %v3156_v14  ;;  %v1575_v17 = vpop.f32.mrb[5].mxu0 }
 0x1d2   : > { %v3321_v37 = vadd.f32 %v1575_v17, %v1043_v58 }
 0x1d3   : > { %v1662_v30 = vadd.f32 %v3320_v32, %v4403_v60 }
 0x1d4   : > { %v1661_v48 = vadd.f32 %v3321_v37, %v4403_v60 }
 0x1d5   : > { %1678 = vst.msk [vmem:[%s4408_s14 + $0x48] sm:$0xff] %vm754_vm13, %v1662_v30  ;;  %1715 = vrot.lane.b32.xlu1 %v1662_v30, %s3449_s23 }
 0x1d6   : > { %1677 = vst.msk [vmem:[%s4408_s14 + $0x40] sm:$0xff] %vm754_vm13, %v1661_v48  ;;  %1713 = vrot.lane.b32.xlu0 %v1661_v48, %s3449_s23 }
 0x1dd   : > { %v2030_v18 = vld [vmem:[%s4408_s14 + $0x40] sm:$0x1] }
 0x1e0   : > { %v3215_v41 = vpop.f32.mrb[6].mxu0 }
 0x1e1   : > { %v3322_v0 = vadd.f32 %v3215_v41, %v3159_v33  ;;  %v1585_v56 = vpop.f32.mrb[7].mxu0 }
 0x1e2   : > { %v3323_v38 = vadd.f32 %v1585_v56, %v1053_v21 }
 0x1e3   : > { %v1664_v29 = vadd.f32 %v3322_v0, %v4403_v60 }
 0x1e4   : > { %v1663_v9 = vadd.f32 %v3323_v38, %v4403_v60 }
 0x1e5   : > { %1680 = vst.msk [vmem:[%s4408_s14 + $0x68] sm:$0xff] %vm754_vm13, %v1664_v29  ;;  %1719 = vrot.lane.b32.xlu1 %v1664_v29, %s3449_s23 }
 0x1e6   : > { %1679 = vst.msk [vmem:[%s4408_s14 + $0x60] sm:$0xff] %vm754_vm13, %v1663_v9  ;;  %1717 = vrot.lane.b32.xlu0 %v1663_v9, %s3449_s23 }
 0x1ed   : > { %v2031_v20 = vld [vmem:[%s4408_s14 + $0x60] sm:$0x1] }
 0x1f0   : > { %v3218_v44 = vpop.f32.mrb[8].mxu0 }
 0x1f1   : > { %v3324_v54 = vadd.f32 %v3218_v44, %v3162_v36  ;;  %v1595_v6 = vpop.f32.mrb[9].mxu0 }
 0x1f2   : > { %v3325_v50 = vadd.f32 %v1595_v6, %v1063_v2 }
 0x1f3   : > { %v1666_v42 = vadd.f32 %v3324_v54, %v4403_v60 }
 0x1f4   : > { %v1665_v46 = vadd.f32 %v3325_v50, %v4403_v60 }
 0x1f5   : > { %1682 = vst.msk [vmem:[%s4408_s14 + $0x88] sm:$0xff] %vm754_vm13, %v1666_v42  ;;  %1723 = vrot.lane.b32.xlu1 %v1666_v42, %s3449_s23 }
 0x1f6   : > { %1681 = vst.msk [vmem:[%s4408_s14 + $0x80] sm:$0xff] %vm754_vm13, %v1665_v46  ;;  %1721 = vrot.lane.b32.xlu0 %v1665_v46, %s3449_s23 }
 0x1fd   : > { %v2032_v48 = vld [vmem:[%s4408_s14 + $0x80] sm:$0x1] }
 0x200   : > { %v3221_v10 = vpop.f32.mrb[10].mxu0 }
 0x201   : > { %v3193_v39 = vpop.f32.mrb[10].mxu1  ;;  %v1605_v27 = vpop.f32.mrb[11].mxu0 }
 0x202   : > { %v3326_v40 = vadd.f32 %v3221_v10, %v3193_v39  ;;  %v1269_v25 = vpop.f32.mrb[11].mxu1 }
 0x203   : > { %v3327_v11 = vadd.f32 %v1605_v27, %v1269_v25 }
 0x204   : > { %v4451_v62 = vadd.f32 %v3326_v40, %v4403_v60 }
 0x205   : > { %v4454_v28 = vadd.f32 %v3327_v11, %v4403_v60 }
 0x206   : > { %1684 = vst.msk [vmem:[%s4408_s14 + $0xa8] sm:$0xff] %vm754_vm13, %v4451_v62 }
 0x207   : > { %1683 = vst.msk [vmem:[%s4408_s14 + $0xa0] sm:$0xff] %vm754_vm13, %v4454_v28 }
 0x20e   : > { %v2033_v41 = vld [vmem:[%s4408_s14 + $0xa0] sm:$0x1] }
 0x210   : > { %v3224_v12 = vpop.f32.mrb[12].mxu0 }
 0x211   : > { %v3196_v5 = vpop.f32.mrb[12].mxu1  ;;  %v1615_v59 = vpop.f32.mrb[13].mxu0 }
 0x212   : > { %v3328_v43 = vadd.f32 %v3224_v12, %v3196_v5  ;;  %v1279_v53 = vpop.f32.mrb[13].mxu1 }
 0x213   : > { %v3329_v52 = vadd.f32 %v1615_v59, %v1279_v53 }
 0x214   : > { %v4463_v7 = vadd.f32 %v3328_v43, %v4403_v60 }
 0x215   : > { %v4466_v34 = vadd.f32 %v3329_v52, %v4403_v60 }
 0x216   : > { %1686 = vst.msk [vmem:[%s4408_s14 + $0xc8] sm:$0xff] %vm754_vm13, %v4463_v7 }
 0x217   : > { %1685 = vst.msk [vmem:[%s4408_s14 + $0xc0] sm:$0xff] %vm754_vm13, %v4466_v34 }
 0x21e   : > { %v2034_v0 = vld [vmem:[%s4408_s14 + $0xc0] sm:$0x1] }
 0x220   : > { %v3227_v4 = vpop.f32.mrb[14].mxu0 }
 0x221   : > { %v3199_v57 = vpop.f32.mrb[14].mxu1  ;;  %v1625_v14 = vpop.f32.mrb[15].mxu0 }
 0x222   : > { %v3330_v58 = vadd.f32 %v3227_v4, %v3199_v57  ;;  %v1289_v33 = vpop.f32.mrb[15].mxu1 }
 0x223   : > { %v3331_v51 = vadd.f32 %v1625_v14, %v1289_v33 }
 0x224   : > { %v4475_v31 = vadd.f32 %v3330_v58, %v4403_v60 }
 0x225   : > { %v4478_v21 = vadd.f32 %v3331_v51, %v4403_v60 }
 0x226   : > { %1688 = vst.msk [vmem:[%s4408_s14 + $0xe8] sm:$0xff] %vm754_vm13, %v4475_v31  ;;  %v1896_v47 = vpop.f32.mrb[16].mxu1 }
 0x227   : > { %1687 = vst.msk [vmem:[%s4408_s14 + $0xe0] sm:$0xff] %vm754_vm13, %v4478_v21  ;;  %v2052_v23 = vsub.f32 %v2028_v55, %v1896_v47  ;;  %v3234_v36 = vpop.f32.mrb[17].mxu1  ;;  %2077 = vrot.lane.b32.xlu0 %v1896_v47, %s3450_s13  ;;  %v1708_v60 = vpop.permute.xlu1 %1707  ;;  %v2037_v26 = vrot.slane %v1896_v47, 1  ;;  %v2038_v2 = vrot.slane %v1896_v47, 2  ;;  %v2039_v15 = vrot.slane %v1896_v47, 3 }
 0x228   : > { %2976 = vst.msk [vmem:[%s4408_s14 + $0x18] sm:$0xff] %vm754_vm13, %v1708_v60  ;;  %v1706_v49 = vpop.permute.xlu0 %1705  ;;  %v2040_v35 = vrot.slane %v1896_v47, 4  ;;  %v2041_v13 = vrot.slane %v1896_v47, 5  ;;  %v2042_v32 = vrot.slane %v1896_v47, 6  ;;  %v2043_v44 = vrot.slane %v1896_v47, 7 }
 0x229   : > { %2061 = vst.msk [vmem:[%s4408_s14] sm:$0x1] %vm2060_vm1, %v2052_v23  ;;  %v2053_v17 = vsub.f32 %v2029_v19, %v2037_v26  ;;  %2079 = vrot.lane.b32.xlu1 %v2037_v26, %s3450_s13  ;;  %v2054_v37 = vsub.f32 %v2030_v18, %v2038_v2  ;;  %v2055_v30 = vsub.f32 %v2031_v20, %v2039_v15 }
 0x22a   : > { %2975 = vst.msk [vmem:[%s4408_s14 + $0x10] sm:$0xff] %vm754_vm13, %v1706_v49  ;;  %v2056_v56 = vsub.f32 %v2032_v48, %v2040_v35  ;;  %v2057_v38 = vsub.f32 %v2033_v41, %v2041_v13  ;;  %v2058_v29 = vsub.f32 %v2034_v0, %v2042_v32  ;;  %v2117_v41 = vld [vmem:[%s4408_s14 + $0xf] sm:$0x1] }
 0x22b   : > { %2062 = vst.msk [vmem:[%s4408_s14 + $0x20] sm:$0x1] %vm2060_vm1, %v2053_v17  ;;  %2063 = vst.msk [vmem:[%s4408_s14 + $0x40] sm:$0x1] %vm2060_vm1, %v2054_v37  ;;  %2081 = vrot.lane.b32.xlu0 %v2038_v2, %s3450_s13 }
 0x22c   : > { %2064 = vst.msk [vmem:[%s4408_s14 + $0x60] sm:$0x1] %vm2060_vm1, %v2055_v30  ;;  %2065 = vst.msk [vmem:[%s4408_s14 + $0x80] sm:$0x1] %vm2060_vm1, %v2056_v56 }
 0x22d   : > { %2066 = vst.msk [vmem:[%s4408_s14 + $0xa0] sm:$0x1] %vm2060_vm1, %v2057_v38  ;;  %2067 = vst.msk [vmem:[%s4408_s14 + $0xc0] sm:$0x1] %vm2060_vm1, %v2058_v29  ;;  %v4514_v9 = vpop.f32.mrb[18].mxu1  ;;  %2083 = vrot.lane.b32.xlu1 %v2039_v15, %s3450_s13 }
 0x22e   : > { %v3241_v54 = vpop.f32.mrb[19].mxu1  ;;  %v2035_v6 = vld [vmem:[%s4408_s14 + $0xe0] sm:$0x1]  ;;  %v2126_v27 = vrot.slane %v4514_v9, 1  ;;  %v2127_v40 = vrot.slane %v4514_v9, 2  ;;  %v2128_v11 = vrot.slane %v4514_v9, 3 }
 0x22f   : > { %v3013_v50 = vld [vmem:[%s4408_s14 + $0x1f] sm:$0x1]  ;;  %2085 = vrot.lane.b32.xlu0 %v2040_v35, %s3450_s13  ;;  %v2059_v42 = vsub.f32 %v2035_v6, %v2043_v44  ;;  %v2129_v5 = vrot.slane %v4514_v9, 4  ;;  %v2130_v59 = vrot.slane %v4514_v9, 5  ;;  %v2131_v43 = vrot.slane %v4514_v9, 6 }
 0x230   : > { %v2190_v46 = vsub.f32 %v3013_v50, %v4514_v9  ;;  %v2132_v52 = vrot.slane %v4514_v9, 7  ;;  %v2118_v38 = vld [vmem:[%s4408_s14 + $0x2f] sm:$0x1] }
 0x231   : > { %2087 = vrot.lane.b32.xlu1 %v2041_v13, %s3450_s13  ;;  %2068 = vst.msk [vmem:[%s4408_s14 + $0xe0] sm:$0x1] %vm2060_vm1, %v2059_v42  ;;  %v2119_v6 = vld [vmem:[%s4408_s14 + $0x4f] sm:$0x1] }
 0x232   : > { %3021 = vst.msk [vmem:[%s4408_s14 + $0x1f] sm:$0x1] %vm2165_vm3, %v2190_v46 }
 0x233   : > { %2089 = vrot.lane.b32.xlu0 %v2042_v32, %s3450_s13 }
 0x235   : > { %2091 = vrot.lane.b32.xlu1 %v2043_v44, %s3450_s13 }
 0x237   : > { %1725 = vrot.lane.b32.xlu0 %v4454_v28, %s3449_s23  ;;  %v1712_v10 = vpop.permute.xlu1 %1711 }
 0x238   : > { %2978 = vst.msk [vmem:[%s4408_s14 + $0x38] sm:$0xff] %vm754_vm13, %v1712_v10  ;;  %v1710_v39 = vpop.permute.xlu0 %1709 }
 0x239   : > { %2977 = vst.msk [vmem:[%s4408_s14 + $0x30] sm:$0xff] %vm754_vm13, %v1710_v39  ;;  %1727 = vrot.lane.b32.xlu1 %v4451_v62, %s3449_s23  ;;  %v2120_v39 = vld [vmem:[%s4408_s14 + $0x6f] sm:$0x1] }
 0x23b   : > { %2133 = vrot.lane.b32.xlu0 %v4514_v9, %s3445_s16  ;;  %v3452_v9 = vmov (!%p3029_p10), 0.0  }
 0x23c   : > { %3249 = vmatprep.subr.mxu1 (!%p3029_p10), %v3452_v9  ;;  %3251 = vmatprep.mubr.msk.f32.mxu1 (!%p3029_p10), %vm3453_vm4, %v3452_v9 }
 0x23d   : > { %2135 = vrot.lane.b32.xlu1 %v2126_v27, %s3445_s16 }
 0x23f   : > { %v3014_v25 = vld [vmem:[%s4408_s14 + $0x3f] sm:$0x1]  ;;  %2137 = vrot.lane.b32.xlu0 %v2127_v40, %s3445_s16 }
 0x240   : > { %v2191_v28 = vsub.f32 %v3014_v25, %v2126_v27  ;;  %v2998_v19 = vld [vmem:[%s4408_s14 + $0x30] sm:$0x1] }
 0x241   : > { %2139 = vrot.lane.b32.xlu1 %v2128_v11, %s3445_s16 }
 0x242   : > { %3022 = vst.msk [vmem:[%s4408_s14 + $0x3f] sm:$0x1] %vm2165_vm3, %v2191_v28 }
 0x243   : > { %1729 = vrot.lane.b32.xlu0 %v4466_v34, %s3449_s23 }
 0x245   : > { %1731 = vrot.lane.b32.xlu1 %v4463_v7, %s3449_s23 }
 0x247   : > { %1733 = vrot.lane.b32.xlu0 %v4478_v21, %s3449_s23  ;;  %v1716_v62 = vpop.permute.xlu1 %1715  ;;  %v2997_v21 = vld [vmem:[%s4408_s14 + $0x10] sm:$0x1] }
 0x248   : > { %2980 = vst.msk [vmem:[%s4408_s14 + $0x58] sm:$0xff] %vm754_vm13, %v1716_v62  ;;  %v1714_v12 = vpop.permute.xlu0 %1713 }
 0x249   : > { %2979 = vst.msk [vmem:[%s4408_s14 + $0x50] sm:$0xff] %vm754_vm13, %v1714_v12  ;;  %1735 = vrot.lane.b32.xlu1 %v4475_v31, %s3449_s23 }
 0x24b   : > { %2141 = vrot.lane.b32.xlu0 %v2129_v5, %s3445_s16 }
 0x24d   : > { %2143 = vrot.lane.b32.xlu1 %v2130_v59, %s3445_s16 }
 0x24f   : > { %v3015_v53 = vld [vmem:[%s4408_s14 + $0x5f] sm:$0x1]  ;;  %2145 = vrot.lane.b32.xlu0 %v2131_v43, %s3445_s16 }
 0x250   : > { %v2192_v7 = vsub.f32 %v3015_v53, %v2127_v40  ;;  %v2999_v60 = vld [vmem:[%s4408_s14 + $0x50] sm:$0x1] }
 0x251   : > { %2147 = vrot.lane.b32.xlu1 %v2132_v52, %s3445_s16 }
 0x252   : > { %3023 = vst.msk [vmem:[%s4408_s14 + $0x5f] sm:$0x1] %vm2165_vm3, %v2192_v7 }
 0x253   : > { %2210 = vrot.lane.b32.xlu0 (!%p3029_p10), %v3819_v61, %s3451_s19  ;;  %v4819_v61 = vld [vmem:[#allocation4_spill] sm:$0xff] (!%p3029_p10) }
 0x257   : > { %v1720_v34 = vpop.permute.xlu1 %1719  ;;  %2212 = vrot.lane.b32.xlu0 (!%p3029_p10), %v3871_v63, %s3451_s19  ;;  %v4822_v63 = vld [vmem:[#allocation8_spill] sm:$0xff] (!%p3029_p10) }
 0x258   : > { %2982 = vst.msk [vmem:[%s4408_s14 + $0x78] sm:$0xff] %vm754_vm13, %v1720_v34  ;;  %v1718_v4 = vpop.permute.xlu0 %1717 }
 0x259   : > { %2981 = vst.msk [vmem:[%s4408_s14 + $0x70] sm:$0xff] %vm754_vm13, %v1718_v4 }
 0x25f   : > { %v3016_v57 = vld [vmem:[%s4408_s14 + $0x7f] sm:$0x1] }
 0x260   : > { %v2193_v14 = vsub.f32 %v3016_v57, %v2128_v11  ;;  %v3000_v2 = vld [vmem:[%s4408_s14 + $0x70] sm:$0x1]  ;;  %v2122_v57 = vld [vmem:[%s4408_s14 + $0xaf] sm:$0x1] }
 0x262   : > { %3024 = vst.msk [vmem:[%s4408_s14 + $0x7f] sm:$0x1] %vm2165_vm3, %v2193_v14 }
 0x267   : > { %v1724_v58 = vpop.permute.xlu1 %1723 }
 0x268   : > { %2984 = vst.msk [vmem:[%s4408_s14 + $0x98] sm:$0xff] %vm754_vm13, %v1724_v58  ;;  %v1722_v33 = vpop.permute.xlu0 %1721 }
 0x269   : > { %2983 = vst.msk [vmem:[%s4408_s14 + $0x90] sm:$0xff] %vm754_vm13, %v1722_v33 }
 0x26f   : > { %v3017_v51 = vld [vmem:[%s4408_s14 + $0x9f] sm:$0x1] }
 0x270   : > { %v2194_v31 = vsub.f32 %v3017_v51, %v2129_v5  ;;  %v3001_v20 = vld [vmem:[%s4408_s14 + $0x90] sm:$0x1] }
 0x272   : > { %3025 = vst.msk [vmem:[%s4408_s14 + $0x9f] sm:$0x1] %vm2165_vm3, %v2194_v31  ;;  %v2123_v31 = vld [vmem:[%s4408_s14 + $0xcf] sm:$0x1] }
 0x299   : > { %v2078_v47 = vpop.permute.xlu0 %2077 }
 0x29a   : > { %v2101_v55 = vsub.f32 %v2997_v21, %v2078_v47 }
 0x29b   : > { %v2080_v23 = vpop.permute.xlu1 %2079 }
 0x29c   : > { %3005 = vst.msk [vmem:[%s4408_s14 + $0x10] sm:$0x1] %vm2060_vm1, %v2101_v55  ;;  %v2102_v36 = vsub.f32 %v2998_v19, %v2080_v23 }
 0x29d   : > { %v2082_v26 = vpop.permute.xlu0 %2081 }
 0x29e   : > { %3006 = vst.msk [vmem:[%s4408_s14 + $0x30] sm:$0x1] %vm2060_vm1, %v2102_v36  ;;  %v2103_v18 = vsub.f32 %v2999_v60, %v2082_v26  ;;  %v2124_v36 = vld [vmem:[%s4408_s14 + $0xef] sm:$0x1]  ;;  %v2312_v26 = vld [vmem:[%s4781_s6] sm:$0xf] (!%p3029_p10) }
 0x29f   : > { %v2084_v15 = vpop.permute.xlu1 %2083  ;;  %3250 = vmatpush3.msk.msra.mxu1 (!%p3029_p10), %vm953_vm0, %v2312_v26 }
 0x2a0   : > { %3007 = vst.msk [vmem:[%s4408_s14 + $0x50] sm:$0x1] %vm2060_vm1, %v2103_v18  ;;  %v2104_v49 = vsub.f32 %v3000_v2, %v2084_v15  ;;  %v2220_v18 = vld [vmem:[%s4780_s5] sm:$0xff] (!%p3029_p10)  ;;  %v2221_v2 = vld [vmem:[%s4780_s5 + $0x8] sm:$0xf] (!%p3029_p10)  ;;  %3254 = vmatprep.subr.mxu1 (!%p3029_p10), %v3452_v9 }
 0x2a1   : > { %v2086_v35 = vpop.permute.xlu0 %2085  ;;  %v3302_v15 = vpack.c.bf16 (!%p3029_p10), %v2221_v2, %v2220_v18 }
 0x2a2   : > { %3008 = vst.msk [vmem:[%s4408_s14 + $0x70] sm:$0x1] %vm2060_vm1, %v2104_v49  ;;  %v2105_v13 = vsub.f32 %v3001_v20, %v2086_v35  ;;  %v4818_v49 = vld [vmem:[#allocation2_spill] sm:$0xff] (!%p3029_p10)  ;;  %v4820_v20 = vld [vmem:[#allocation7_spill] sm:$0xff] (!%p3029_p10) }
 0x2a3   : > { %v2088_v32 = vpop.permute.xlu1 %2087  ;;  %3252 = vmatmul.mubr.msk.f32.vlgmr.msra.gmra.mrb[0].mxu1 (!%p3029_p10), %vm737_vm12, %v4818_v49  ;;  %3304 = vmatprep.subr.msk.bf16.mxu0 (!%p3029_p10), %vm3549_vm2, %v3302_v15  ;;  %v4821_v35 = vld [vmem:[#allocation3_spill] sm:$0xff] (!%p3029_p10) }
 0x2a4   : > { %3009 = vst.msk [vmem:[%s4408_s14 + $0x90] sm:$0x1] %vm2060_vm1, %v2105_v13  ;;  %3256 = vmatprep.mubr.msk.f32.mxu1 (!%p3029_p10), %vm3453_vm4, %v3452_v9  ;;  %3307 = vmatpush3.bf16.msk.msra.mxu0 (!%p3029_p10), %vm3549_vm2, %v3302_v15  ;;  %v2216_v13 = vsel (!%p3029_p10), %vm737_vm12, %v4821_v35, %v4820_v20 }
 0x2a5   : > { %v2090_v17 = vpop.permute.xlu0 %2089 }
 0x2a7   : > { %v2092_v37 = vpop.permute.xlu1 %2091 }
 0x2a9   : > { %v1726_v30 = vpop.permute.xlu0 %1725 }
 0x2aa   : > { %2985 = vst.msk [vmem:[%s4408_s14 + $0xb0] sm:$0xff] %vm754_vm13, %v1726_v30 }
 0x2ab   : > { %v1728_v48 = vpop.permute.xlu1 %1727 }
 0x2ac   : > { %2986 = vst.msk [vmem:[%s4408_s14 + $0xb8] sm:$0xff] %vm754_vm13, %v1728_v48 }
 0x2ad   : > { %v2134_v0 = vpop.permute.xlu0 %2133 }
 0x2ae   : > { %v2157_v56 = vsub.f32 %v2117_v41, %v2134_v0 }
 0x2af   : > { %v2136_v29 = vpop.permute.xlu1 %2135 }
 0x2b0   : > { %2166 = vst.msk [vmem:[%s4408_s14 + $0xf] sm:$0x1] %vm2165_vm3, %v2157_v56  ;;  %v2158_v44 = vsub.f32 %v2118_v38, %v2136_v29 }
 0x2b1   : > { %v3002_v54 = vld [vmem:[%s4408_s14 + $0xb0] sm:$0x1]  ;;  %v2138_v50 = vpop.permute.xlu0 %2137 }
 0x2b2   : > { %v2106_v42 = vsub.f32 %v3002_v54, %v2088_v32  ;;  %2167 = vst.msk [vmem:[%s4408_s14 + $0x2f] sm:$0x1] %vm2165_vm3, %v2158_v44  ;;  %v2159_v46 = vsub.f32 %v2119_v6, %v2138_v50  ;;  %v2306_v54 = vld [vmem:[%s4408_s14] sm:$0xff] (!%p3029_p10) }
 0x2b3   : > { %v3018_v10 = vld [vmem:[%s4408_s14 + $0xbf] sm:$0x1]  ;;  %v2140_v27 = vpop.permute.xlu1 %2139 }
 0x2b4   : > { %3010 = vst.msk [vmem:[%s4408_s14 + $0xb0] sm:$0x1] %vm2060_vm1, %v2106_v42  ;;  %v2195_v40 = vsub.f32 %v3018_v10, %v2130_v59  ;;  %v2160_v25 = vsub.f32 %v2120_v39, %v2140_v27  ;;  %v2121_v59 = vld [vmem:[%s4408_s14 + $0x8f] sm:$0x1] }
 0x2b5   : > { %2168 = vst.msk [vmem:[%s4408_s14 + $0x4f] sm:$0x1] %vm2165_vm3, %v2159_v46  ;;  %v1730_v11 = vpop.permute.xlu0 %1729 }
 0x2b6   : > { %3026 = vst.msk [vmem:[%s4408_s14 + $0xbf] sm:$0x1] %vm2165_vm3, %v2195_v40  ;;  %2169 = vst.msk [vmem:[%s4408_s14 + $0x6f] sm:$0x1] %vm2165_vm3, %v2160_v25 }
 0x2b7   : > { %2987 = vst.msk [vmem:[%s4408_s14 + $0xd0] sm:$0xff] %vm754_vm13, %v1730_v11  ;;  %v1732_v28 = vpop.permute.xlu1 %1731  ;;  %v2307_v44 = vld [vmem:[%s4408_s14 + $0x8] sm:$0xff] (!%p3029_p10) }
 0x2b8   : > { %2988 = vst.msk [vmem:[%s4408_s14 + $0xd8] sm:$0xff] %vm754_vm13, %v1732_v28 }
 0x2b9   : > { %v1734_v62 = vpop.permute.xlu0 %1733 }
 0x2ba   : > { %2989 = vst.msk [vmem:[%s4408_s14 + $0xf0] sm:$0xff] %vm754_vm13, %v1734_v62 }
 0x2bb   : > { %v1736_v12 = vpop.permute.xlu1 %1735 }
 0x2bc   : > { %2990 = vst.msk [vmem:[%s4408_s14 + $0xf8] sm:$0xff] %vm754_vm13, %v1736_v12 }
 0x2bd   : > { %v2142_v53 = vpop.permute.xlu0 %2141 }
 0x2be   : > { %v3003_v5 = vld [vmem:[%s4408_s14 + $0xd0] sm:$0x1]  ;;  %v2161_v34 = vsub.f32 %v2121_v59, %v2142_v53 }
 0x2bf   : > { %v2107_v7 = vsub.f32 %v3003_v5, %v2090_v17  ;;  %v3019_v4 = vld [vmem:[%s4408_s14 + $0xdf] sm:$0x1]  ;;  %v2144_v14 = vpop.permute.xlu1 %2143 }
 0x2c0   : > { %v2196_v58 = vsub.f32 %v3019_v4, %v2131_v43  ;;  %2170 = vst.msk [vmem:[%s4408_s14 + $0x8f] sm:$0x1] %vm2165_vm3, %v2161_v34  ;;  %v2162_v33 = vsub.f32 %v2122_v57, %v2144_v14  ;;  %2209 = sbr.rel (%p3029_p10) target bundleno = 1040 (0x410), region = 56 }
 0x2c1   : > { %3011 = vst.msk [vmem:[%s4408_s14 + $0xd0] sm:$0x1] %vm2060_vm1, %v2107_v7  ;;  %v3004_v51 = vld [vmem:[%s4408_s14 + $0xf0] sm:$0x1]  ;;  %v2146_v21 = vpop.permute.xlu0 %2145 }
 0x2c2   : > { %3027 = vst.msk [vmem:[%s4408_s14 + $0xdf] sm:$0x1] %vm2165_vm3, %v2196_v58  ;;  %v2108_v47 = vsub.f32 %v3004_v51, %v2092_v37  ;;  %2171 = vst.msk [vmem:[%s4408_s14 + $0xaf] sm:$0x1] %vm2165_vm3, %v2162_v33  ;;  %v2163_v55 = vsub.f32 %v2123_v31, %v2146_v21  ;;  %v4823_v37 = vld [vmem:[#allocation5_spill] sm:$0xff] (!%p3029_p10) }
 0x2c3   : > { %v3020_v19 = vld [vmem:[%s4408_s14 + $0xff] sm:$0x1]  ;;  %v2148_v23 = vpop.permute.xlu1 %2147  ;;  %v2217_v30 = vsel (!%p3029_p10), %vm737_vm12, %v4823_v37, %v4822_v63 }
 0x2c4   : > { %3012 = vst.msk [vmem:[%s4408_s14 + $0xf0] sm:$0x1] %vm2060_vm1, %v2108_v47  ;;  %v2197_v43 = vsub.f32 %v3020_v19, %v2132_v52  ;;  %v2164_v60 = vsub.f32 %v2124_v36, %v2148_v23  ;;  %v3035_v52 = vld [vmem:[%s4781_s6 + $0x4] sm:$0xf] (!%p3029_p10) }
 0x2c5   : > { %2172 = vst.msk [vmem:[%s4408_s14 + $0xcf] sm:$0x1] %vm2165_vm3, %v2163_v55  ;;  %3255 = vmatpush3.msk.msra.mxu1 (!%p3029_p10), %vm953_vm0, %v3035_v52  ;;  %v2211_v32 = vpop.permute.xlu0 (!%p3029_p10), %2210 }
 0x2c6   : > { %3028 = vst.msk [vmem:[%s4408_s14 + $0xff] sm:$0x1] %vm2165_vm3, %v2197_v43  ;;  %2173 = vst.msk [vmem:[%s4408_s14 + $0xef] sm:$0x1] %vm2165_vm3, %v2164_v60  ;;  %3257 = vmatmul.mubr.msk.f32.vlgmr.msra.gmra.mrb[2].mxu1 (!%p3029_p10), %vm737_vm12, %v4819_v61  ;;  %v2218_v17 = vsel (!%p3029_p10), %vm754_vm13, %v2216_v13, %v2211_v32 }
 0x2c7   : > { %3246 = vmatprep.mubr.msk.f32.mxu0 %vm904_vm14, %v2218_v17 }
 0x2c9   : > { %v2213_v48 = vpop.permute.xlu0 %2212 }
 0x2ca   : > { %v2219_v41 = vsel %vm754_vm13, %v2217_v30, %v2213_v48 }
 0x2cb   : > { %3247 = vmatmul.mubr.msk.f32.vlgmr.msra.gmra.mrb[0].mxu0 %vm904_vm14, %v2219_v41 }
 0x376   : > { %v2384_v0 = vpop.f32.mrb[0].mxu1 }
 0x377   : > { %v3253_v56 = vpop.f32.mrb[1].mxu1 }
 0x399   : > { %v2461_v38 = vpop.f32.mrb[2].mxu1 }
 0x39a   : > { %2470 = vrot.lane.b32.xlu1 %v2461_v38, %s3454_s24  ;;  %v3258_v29 = vpop.f32.mrb[3].mxu1 }
 0x39e   : > { %v3248_v6 = vpop.f32.mrb[0].mxu0 }
 0x39f   : > { %v2309_v50 = vsub.f32 %v2307_v44, %v3248_v6  ;;  %v2297_v42 = vpop.f32.mrb[1].mxu0 }
 0x3a0   : > { %v2308_v46 = vsub.f32 %v2306_v54, %v2297_v42 }
 0x3a1   : > { %2311 = vst.msk [vmem:[%s4408_s14 + $0x8] sm:$0xff] %vm754_vm13, %v2309_v50 }
 0x3a2   : > { %2310 = vst.msk [vmem:[%s4408_s14] sm:$0xff] %vm754_vm13, %v2308_v46 }
 0x3a8   : > { %v2468_v39 = vld [vmem:[%s4408_s14 + $0xf] sm:$0x1] }
 0x3a9   : > { %v2465_v27 = vld [vmem:[%s4408_s14] sm:$0x1] }
 0x3aa   : > { %v2466_v25 = vadd.f32 %v2465_v27, %v2384_v0 }
 0x3ac   : > { %2467 = vst.msk [vmem:[%s4408_s14] sm:$0x1] %vm2060_vm1, %v2466_v25 }
 0x40c   : > { %v2471_v10 = vpop.permute.xlu1 %2470 }
 0x40d   : > { %v2473_v40 = vadd.f32 %v2471_v10, %v2468_v39 }
 0x40f   : > { %2474 = vst.msk [vmem:[%s4408_s14 + $0xf] sm:$0x1] %vm2165_vm3, %v2473_v40 }
 0x410 PF: > { %p3038_p11 = scmp.ne.s32.totalorder %s3425_s27, 1 }
 0x411   : > { %v3048_v11 = vld [vmem:[%s4781_s6 + $0x8] sm:$0xf] (!%p3038_p11)  ;;  %v3039_v28 = vld [vmem:[%s4780_s5 + $0x10] sm:$0xff] (!%p3038_p11)  ;;  %v3455_v5 = vmov (!%p3038_p11), 0.0   ;;  %vm3456_vm5 = vmmov (!%p3038_p11), 0   ;;  %v4825_v4 = vld [vmem:[#allocation6_spill] sm:$0xff] (!%p3038_p11) }
 0x412   : > { %2478 = sbr.rel (%p3038_p11) target bundleno = 1378 (0x562), region = 60  ;;  %v4824_v62 = vld [vmem:[#allocation11_spill] sm:$0xff] (!%p3038_p11)  ;;  %3266 = vmatprep.subr.mxu1 (!%p3038_p11), %v3455_v5  ;;  %3268 = vmatprep.mubr.msk.f32.mxu1 (!%p3038_p11), %vm3456_vm5, %v3455_v5  ;;  %v3040_v59 = vld [vmem:[%s4780_s5 + $0x18] sm:$0xf] (!%p3038_p11)  ;;  %v4826_v57 = vrot.slane (!%p3038_p11), %v4825_v4, 7  ;;  %s3457_s25 = smov (!%p3038_p11), 4  }
 0x413   : > { %v2480_v12 = vsel (!%p3038_p11), %vm737_vm12, %v4824_v62, %v4273_v8  ;;  %v3051_v53 = vld [vmem:[%s4781_s6 + $0xc] sm:$0xf] (!%p3038_p11)  ;;  %3267 = vmatpush3.msk.msra.mxu1 (!%p3038_p11), %vm953_vm0, %v3048_v11  ;;  %v3308_v34 = vpack.c.bf16 (!%p3038_p11), %v3040_v59, %v3039_v28  ;;  %v2481_v8 = vsel (!%p3038_p11), %vm737_vm12, %v4138_v16, %v4278_v45 }
 0x414   : > { %v2482_v7 = vsel (!%p3038_p11), %vm754_vm13, %v2480_v12, %v4326_v24  ;;  %3269 = vmatmul.mubr.msk.f32.vlgmr.msra.gmra.mrb[0].mxu1 (!%p3038_p11), %vm737_vm12, %v3830_v1  ;;  %3271 = vmatprep.subr.mxu1 (!%p3038_p11), %v3455_v5  ;;  %v2483_v24 = vsel (!%p3038_p11), %vm754_vm13, %v2481_v8, %v4334_v22  ;;  %v3044_v14 = vld [vmem:[%s4408_s14 + $0xf0] sm:$0xff] (!%p3038_p11) }
 0x415   : > { %3263 = vmatprep.mubr.msk.f32.mxu0 (!%p3038_p11), %vm904_vm14, %v2482_v7  ;;  %3310 = vmatprep.subr.msk.bf16.mxu0 (!%p3038_p11), %vm3549_vm2, %v3308_v34 }
 0x416   : > { %3272 = vmatpush3.msk.msra.mxu1 (!%p3038_p11), %vm953_vm0, %v3051_v53  ;;  %3313 = vmatpush3.bf16.msk.msra.mxu0 (!%p3038_p11), %vm3549_vm2, %v3308_v34  ;;  %v3045_v45 = vld [vmem:[%s4408_s14 + $0xf8] sm:$0xff] (!%p3038_p11) }
 0x417   : > { %3273 = vmatprep.mubr.msk.f32.mxu1 (!%p3038_p11), %vm3456_vm5, %v3455_v5 }
 0x418   : > { %3274 = vmatmul.mubr.msk.f32.vlgmr.msra.gmra.mrb[2].mxu1 (!%p3038_p11), %vm737_vm12, %v4826_v57 }
 0x419   : > { %3264 = vmatmul.mubr.msk.f32.vlgmr.msra.gmra.mrb[0].mxu0 %vm904_vm14, %v2483_v24 }
 0x4e7   : > { %v2651_v1 = vpop.f32.mrb[0].mxu1 }
 0x4e8   : > { %v3270_v16 = vpop.f32.mrb[1].mxu1 }
 0x4eb   : > { %v2728_v3 = vpop.f32.mrb[2].mxu1 }
 0x4ec   : > { %v3265_v58 = vpop.f32.mrb[0].mxu0  ;;  %v3275_v33 = vpop.f32.mrb[3].mxu1  ;;  %2737 = vrot.lane.b32.xlu0 %v2728_v3, %s3457_s25 }
 0x4ed   : > { %v2575_v22 = vsub.f32 %v3045_v45, %v3265_v58  ;;  %v2562_v51 = vpop.f32.mrb[1].mxu0 }
 0x4ee   : > { %v2574_v31 = vsub.f32 %v3044_v14, %v2562_v51 }
 0x4ef   : > { %3047 = vst.msk [vmem:[%s4408_s14 + $0xf8] sm:$0xff] %vm754_vm13, %v2575_v22 }
 0x4f0   : > { %3046 = vst.msk [vmem:[%s4408_s14 + $0xf0] sm:$0xff] %vm754_vm13, %v2574_v31 }
 0x4f6   : > { %v3056_v55 = vld [vmem:[%s4408_s14 + $0xff] sm:$0x1] }
 0x4f7   : > { %v3054_v21 = vld [vmem:[%s4408_s14 + $0xf0] sm:$0x1] }
 0x4f8   : > { %v2733_v47 = vadd.f32 %v3054_v21, %v2651_v1 }
 0x4fa   : > { %3055 = vst.msk [vmem:[%s4408_s14 + $0xf0] sm:$0x1] %vm2060_vm1, %v2733_v47 }
 0x55e   : > { %v2738_v19 = vpop.permute.xlu0 %2737 }
 0x55f   : > { %v2740_v23 = vadd.f32 %v3056_v55, %v2738_v19 }
 0x561   : > { %3057 = vst.msk [vmem:[%s4408_s14 + $0xff] sm:$0x1] %vm2165_vm3, %v2740_v23 }
 0x562 PF: > { %s18_s9 = sadd.s32 1, %s3441_s9   ;;  %s4827_s27 = smov %s3433_s29 }
 0x563   : > { %p15_p12 = scmp.ge.s32.totalorder %s18_s9, 6   ;;  %s4828_s28 = smov %s3437_s30 }
 0x564   : > { %s4829_s29 = smov %s4832_s10  ;;  %s4830_s30 = smov %s4836_s11 }
 0x565   :  { %17 = sbr.rel (!%p15_p12) target bundleno = 3 (0x3), region = 105 }

</bundles_post_ra>
